<compile_context>
chip_gen: v5e
topology: v5e:2x2
jax: 0.10.0
libtpu: 0.0.40
codegen_flags: <defaults>
</compile_context>

<pallas_src>
import functools

import jax
import jax.numpy as jnp
from jax import lax
from jax.experimental import pallas as pl
from jax.experimental.pallas import tpu as pltpu

NEG_SLOPE = 0.01  # nn.LeakyReLU default


def _round_up(x, m):
    return (x + m - 1) // m * m


def _leaky(v):
    return jnp.where(v > 0, v, NEG_SLOPE * v)


def _vmem_capacity_bytes():
    """Per-core VMEM capacity; conservative 64 MiB (v7x) fallback."""
    try:
        info = pltpu.get_tpu_info()
        cap = getattr(info, "vmem_capacity_bytes", None)
        if cap:
            return int(cap)
    except Exception:
        pass
    return 64 * 1024 * 1024


def _vmem_bytes_estimate(TH, W, cin_p, cout_p, cd, out_sz):
    """Rough per-grid-step VMEM footprint (bytes) of the kernel below."""
    M = TH * W
    E1 = (TH + 2) * W + 2
    mh_pad = _round_up((TH + 4) * W + 4, 128)
    dbuf = 2 * (cin_p * mh_pad * cd + cout_p * M * out_sz            # x / out
                + 9 * cin_p * cout_p * cd + 9 * cout_p * cout_p * cd  # w1 / w2
                + cin_p * cout_p * cd + 3 * cout_p * 4)               # w3 / b
    tmp = (9 * cin_p * E1 * cd        # conv1 im2col stack
           + 2 * cout_p * E1 * 4      # conv1 acc + y1 (f32)
           + cout_p * E1 * cd         # y1 cast to MXU dtype
           + 9 * cout_p * M * cd      # conv2 im2col stack
           + 2 * cout_p * M * 4       # conv2 acc + shortcut (f32)
           + cin_p * M * cd)          # shortcut input slice
    return dbuf + int(1.25 * tmp)


def _pick_row_tile(H, W, N, cin_p, cout_p, cd, out_sz, budget):
    """Largest row tile TH that (a) tiles H, (b) keeps the flattened output
    block lane-aligned (TH*W % 128 == 0, or TH == H), (c) fits the VMEM
    budget, and (d) leaves >= 2 parallel grid steps when possible (v7x)."""
    cands = sorted({th for th in range(1, H + 1)
                    if H % th == 0 and ((th * W) % 128 == 0 or th == H)},
                   reverse=True)
    fits = [th for th in cands
            if _vmem_bytes_estimate(th, W, cin_p, cout_p, cd, out_sz) <= budget]
    if not fits:
        fits = [cands[-1]]                       # smallest available tile
    for th in fits:                              # keep >= 2 grid steps if we can
        if N * (H // th) >= 2:
            return th
    return fits[0]


# ---------------------------------------------------------------------------
# Kernel: one (batch, row-block) per grid step.
def conv_block_kernel(xb_ref, w1_ref, b1_ref, w2_ref, b2_ref, w3_ref, b3_ref,
                      out_ref, *, W, TH, precision):
    """
    xb_ref : (Cin_p, Mh_pad)      halo'd input window, channel-major, flat
                                  pixels on lanes.  Layout: 2 zero margin
                                  lanes, then (TH+4)*W window pixels (2 halo
                                  rows each side), then zero padding.
    w1_ref : (Cout_p, 9*Cin_p)    conv1 weights, im2col layout (tap-major K)
    w2_ref : (Cout_p, 9*Cout_p)   conv2 weights, im2col layout
    w3_ref : (Cout_p, Cin_p)      1x1 shortcut conv
    b*_ref : (Cout_p, 1)          float32 biases (broadcast along lanes)
    out_ref: (Cout_p, TH*W)       lane-dense output block (flattened NCHW)
    """
    cdt = xb_ref.dtype
    M = out_ref.shape[1]                 # TH * W   output pixels
    M1 = (TH + 2) * W                    # conv1 evaluated on TH+2 halo rows
    E1 = M1 + 2                          # ... plus 1 margin column each side
    LPAD = 2                             # zero lanes prepended to the window

    blk = pl.program_id(1)
    nblk = pl.num_programs(1)

    x = xb_ref[...]                      # (Cin_p, Mh_pad)

    def col_of(idx):                     # column of a flat pixel index
        return (idx & (W - 1)) if (W & (W - 1)) == 0 else (idx % W)

    # Hoisted border masks (one compare per side per width, reused by all taps).
    e_idx = lax.broadcasted_iota(jnp.int32, (1, E1), 1)
    col1 = col_of(e_idx - 1)             # conv1 position p = e - 1
    ok_l1, ok_r1 = col1 > 0, col1 < W - 1
    q_idx = lax.broadcasted_iota(jnp.int32, (1, M), 1)
    col2 = col_of(q_idx)
    ok_l2, ok_r2 = col2 > 0, col2 < W - 1

    zero = jnp.zeros((), cdt)

    def im2col(src, start0, width, ok_l, ok_r):
        """Stack the 9 taps along the contraction axis: (9*C, width)."""
        pieces = []
        for dy in (-1, 0, 1):
            for dx in (-1, 0, 1):
                s = start0 + (dy + 1) * W + dx          # always >= 0
                t = src[:, s:s + width]
                if dx == 1:
                    t = jnp.where(ok_r, t, zero)
                elif dx == -1:
                    t = jnp.where(ok_l, t, zero)
                pieces.append(t)
        return jnp.concatenate(pieces, axis=0)

    # --- conv1 (3x3, pad=1) + LeakyReLU: one im2col matmul on TH+2 rows -----
    t1 = im2col(x, LPAD - 1, E1, ok_l1, ok_r1)                # (9*Cin_p, E1)
    acc1 = jnp.dot(w1_ref[...], t1, preferred_element_type=jnp.float32,
                   precision=precision) + b1_ref[...]
    y1 = _leaky(acc1)                                         # (Cout_p, E1) f32

    # conv2 zero-pads *its own* input: margin columns are always zero and the
    # halo rows that fall outside the image (top row on the first block,
    # bottom row on the last) are zero too.  Explicit, per review.
    keep = (e_idx >= 1) & (e_idx <= M1)
    keep = keep & jnp.logical_or(blk > 0, e_idx >= W + 1)
    keep = keep & jnp.logical_or(blk < nblk - 1, e_idx < (TH + 1) * W + 1)
    y1 = jnp.where(keep, y1, 0.0).astype(cdt)

    # --- conv2 (3x3, pad=1) + LeakyReLU: one im2col matmul on TH rows -------
    t2 = im2col(y1, 1, M, ok_l2, ok_r2)                       # (9*Cout_p, M)
    acc2 = jnp.dot(w2_ref[...], t2, preferred_element_type=jnp.float32,
                   precision=precision) + b2_ref[...]
    y2 = _leaky(acc2)

    # --- 1x1 shortcut on the block's centre rows -----------------------------
    xc = x[:, LPAD + 2 * W: LPAD + 2 * W + M]                 # (Cin_p, M)
    sc = jnp.dot(w3_ref[...], xc, preferred_element_type=jnp.float32,
                 precision=precision) + b3_ref[...]

    out_ref[...] = (y2 + sc).astype(out_ref.dtype)


# ---------------------------------------------------------------------------
@functools.partial(jax.jit, static_argnames=("strides", "use_bf16"))
def _conv_block_impl(x_nchw, w1, b1, w2, b2, w3, b3, strides, use_bf16):
    assert strides == 1, "only stride=1 (the module default) is supported"
    N, Cin, H, W = x_nchw.shape
    Cout = w1.shape[0]

    cdt = jnp.bfloat16 if use_bf16 else jnp.float32
    cd = 2 if use_bf16 else 4
    # bf16 packs along sublanes -> keep channel blocks 16-aligned so the
    # in-kernel im2col concat stays tile-aligned.
    align = 16 if use_bf16 else 8
    Cin_p = _round_up(Cin, align)
    Cout_p = _round_up(Cout, align)
    precision = None if use_bf16 else lax.Precision.HIGHEST
    out_sz = jnp.dtype(x_nchw.dtype).itemsize

    vmem_cap = _vmem_capacity_bytes()
    TH = _pick_row_tile(H, W, N, Cin_p, Cout_p, cd, out_sz, vmem_cap // 2)
    nb = H // TH
    M = TH * W                           # output pixels per row block
    Mh = (TH + 4) * W                    # window pixels (2-row halo each side)
    LPAD = 2                             # lane margin so all tap offsets >= 0
    Mh_pad = _round_up(Mh + 2 * LPAD, 128)

    # ---- input windows: (N, nb, Cin_p, Mh_pad), flat pixels on lanes --------
    xf = x_nchw.astype(cdt)
    xp = jnp.pad(xf, ((0, 0), (0, 0), (2, 2), (0, 0)))        # 2 zero rows t/b
    xb = jnp.stack([xp[:, :, i * TH:i * TH + TH + 4, :] for i in range(nb)],
                   axis=1).reshape(N, nb, Cin, Mh)
    xb = jnp.pad(xb, ((0, 0), (0, 0), (0, Cin_p - Cin),
                      (LPAD, Mh_pad - Mh - LPAD)))

    # ---- weights: PyTorch OIHW -> im2col (Cout_p, 9*Cin_p) matrices ---------
    def prep3x3(w, cin, cin_p):
        wt = jnp.transpose(w, (2, 3, 1, 0))                   # (3,3,cin,Cout)
        wt = jnp.pad(wt, ((0, 0), (0, 0), (0, cin_p - cin),
                          (0, Cout_p - Cout)))
        return wt.reshape(9 * cin_p, Cout_p).T.astype(cdt)

    w1m = prep3x3(w1, Cin, Cin_p)                             # (Cout_p, 9*Cin_p)
    w2m = prep3x3(w2, Cout, Cout_p)                           # (Cout_p, 9*Cout_p)
    w3m = jnp.pad(w3[:, :, 0, 0],
                  ((0, Cout_p - Cout), (0, Cin_p - Cin))).astype(cdt)

    def prep_bias(b):
        return jnp.pad(b, (0, Cout_p - Cout)).reshape(Cout_p, 1).astype(
            jnp.float32)

    b1c, b2c, b3c = prep_bias(b1), prep_bias(b2), prep_bias(b3)

    kern = functools.partial(conv_block_kernel, W=W, TH=TH, precision=precision)
    full = lambda a: pl.BlockSpec(a.shape, lambda n, i: (0,) * a.ndim)

    out_flat = pl.pallas_call(
        kern,
        out_shape=jax.ShapeDtypeStruct((N, Cout_p, H * W), x_nchw.dtype),
        grid=(N, nb),
        in_specs=[
            pl.BlockSpec((pl.Squeezed(), pl.Squeezed(), Cin_p, Mh_pad),
                         lambda n, i: (n, i, 0, 0)),
            full(w1m), full(b1c), full(w2m), full(b2c), full(w3m), full(b3c),
        ],
        out_specs=pl.BlockSpec((pl.Squeezed(), Cout_p, M),
                               lambda n, i: (n, 0, i)),
        compiler_params=pltpu.CompilerParams(
            dimension_semantics=("parallel", "parallel"),
            vmem_limit_bytes=min(int(0.8 * vmem_cap), 100 * 1024 * 1024)),
    )(xb, w1m, b1c, w2m, b2c, w3m, b3c)

    # (N, Cout_p, H*W) is flattened NCHW -> slice channel padding + reshape.
    return out_flat[:, :Cout, :].reshape(N, Cout, H, W)


def conv_block(x_nchw, w1, b1, w2, b2, w3, b3, strides=1, use_bf16=False):
    """ConvBlock forward.  x_nchw: (N, Cin, H, W); weights in PyTorch OIHW.

    use_bf16=True runs the MXU on bf16 operands with f32 accumulation
    (recommended on v6e/v7x); use_bf16=False keeps true f32 numerics via
    precision=HIGHEST matmuls (module-faithful, v5e-friendly).
    """
    return _conv_block_impl(x_nchw, w1, b1, w2, b2, w3, b3,
                            strides=strides, use_bf16=use_bf16)


# ---------------------------------------------------------------------------
def _reference(x, w1, b1, w2, b2, w3, b3, bf16_operands=False):
    """Pure-JAX reference matching PyTorch semantics (NCHW, OIHW).

    With bf16_operands=True the conv operands are rounded to bf16 (f32
    accumulation), mirroring the kernel's use_bf16=True quantisation points.
    """
    if bf16_operands:
        q = lambda a: a.astype(jnp.bfloat16).astype(jnp.float32)
    else:
        q = lambda a: a
    dn = lax.conv_dimension_numbers(x.shape, w1.shape, ("NCHW", "OIHW", "NCHW"))

    def conv(v, w, b, pad):
        y = lax.conv_general_dilated(q(v), q(w), (1, 1),
                                     [(pad, pad), (pad, pad)],
                                     dimension_numbers=dn,
                                     precision=lax.Precision.HIGHEST)
        return y + b.reshape(1, -1, 1, 1)

    out1 = _leaky(conv(_leaky(conv(x, w1, b1, 1)), w2, b2, 1))
    return out1 + conv(x, w3, b3, 0)


if __name__ == "__main__":
    N, Cin, Cout, H, W = 2, 4, 8, 16, 16

    key = jax.random.PRNGKey(0)
    ks = jax.random.split(key, 7)
    # Deterministic synthetic parameters (PyTorch layouts: OIHW weights).
    w1 = 0.1 * jax.random.normal(ks[0], (Cout, Cin, 3, 3), jnp.float32)
    b1 = 0.1 * jax.random.normal(ks[1], (Cout,), jnp.float32)
    w2 = 0.1 * jax.random.normal(ks[2], (Cout, Cout, 3, 3), jnp.float32)
    b2 = 0.1 * jax.random.normal(ks[3], (Cout,), jnp.float32)
    w3 = 0.1 * jax.random.normal(ks[4], (Cout, Cin, 1, 1), jnp.float32)
    b3 = 0.1 * jax.random.normal(ks[5], (Cout,), jnp.float32)

    x = jax.random.normal(ks[6], (N, Cin, H, W), jnp.float32)

    # f32 path (module-faithful numerics, precision=HIGHEST matmuls).
    out = jax.block_until_ready(conv_block(x, w1, b1, w2, b2, w3, b3))
    ref = _reference(x, w1, b1, w2, b2, w3, b3)
    assert out.shape == (N, Cout, H, W)
    assert jnp.allclose(out, ref, rtol=1e-4, atol=1e-4), "f32 path mismatch"

    # bf16-MXU path (recommended on v6e/v7x): bf16 operands, f32 accumulation.
    out_bf = jax.block_until_ready(
        conv_block(x, w1, b1, w2, b2, w3, b3, use_bf16=True))
    ref_bf = _reference(x, w1, b1, w2, b2, w3, b3, bf16_operands=True)
    assert jnp.allclose(out_bf, ref_bf, rtol=5e-3, atol=5e-3), \
        "bf16 path mismatch"

    print("KERNEL_OK")
</pallas_src>

<mosaic_0001>
module attributes {stable_mosaic.version = 11 : i64} {
  func.func @conv_block_kernel(%arg0: i32, %arg1: i32, %arg2: memref<1x1x8x384xf32, #tpu.memory_space<vmem>>, %arg3: memref<8x72xf32, #tpu.memory_space<vmem>>, %arg4: memref<8x1xf32, #tpu.memory_space<vmem>>, %arg5: memref<8x72xf32, #tpu.memory_space<vmem>>, %arg6: memref<8x1xf32, #tpu.memory_space<vmem>>, %arg7: memref<8x8xf32, #tpu.memory_space<vmem>>, %arg8: memref<8x1xf32, #tpu.memory_space<vmem>>, %arg9: memref<1x8x256xf32, #tpu.memory_space<vmem>>) attributes {dimension_semantics = [#tpu.dimension_semantics<parallel>, #tpu.dimension_semantics<parallel>], iteration_bounds = array<i64: 2, 1>, scalar_prefetch = 0 : i64, scratch_operands = 0 : i64, tpu.core_type = #tpu.core_type<tc>, window_params = [{transform_indices = @transform_0, window_bounds = array<i64: 1, 1, 8, 384>}, {pipeline_mode = #tpu.pipeline_mode<synchronous>, transform_indices = @transform_1, window_bounds = array<i64: 8, 72>}, {pipeline_mode = #tpu.pipeline_mode<synchronous>, transform_indices = @transform_2, window_bounds = array<i64: 8, 1>}, {pipeline_mode = #tpu.pipeline_mode<synchronous>, transform_indices = @transform_3, window_bounds = array<i64: 8, 72>}, {pipeline_mode = #tpu.pipeline_mode<synchronous>, transform_indices = @transform_4, window_bounds = array<i64: 8, 1>}, {pipeline_mode = #tpu.pipeline_mode<synchronous>, transform_indices = @transform_5, window_bounds = array<i64: 8, 8>}, {pipeline_mode = #tpu.pipeline_mode<synchronous>, transform_indices = @transform_6, window_bounds = array<i64: 8, 1>}, {transform_indices = @transform_7, window_bounds = array<i64: 1, 8, 256>}]} {
    %c0 = arith.constant 0 : index
    %c0_0 = arith.constant 0 : index
    %c0_1 = arith.constant 0 : index
    %c0_2 = arith.constant 0 : index
    %0 = vector.load %arg2[%c0, %c0_0, %c0_1, %c0_2] : memref<1x1x8x384xf32, #tpu.memory_space<vmem>>, vector<1x1x8x384xf32>
    %1 = vector.shape_cast %0 : vector<1x1x8x384xf32> to vector<8x384xf32>
    %2 = tpu.iota {dimensions = array<i32: 1>} : vector<1x290xi32>
    %c1_i32 = arith.constant 1 : i32
    %3 = vector.broadcast %c1_i32 : i32 to vector<1x290xi32>
    %4 = arith.subi %2, %3 : vector<1x290xi32>
    %c15_i32 = arith.constant 15 : i32
    %5 = vector.broadcast %c15_i32 : i32 to vector<1x290xi32>
    %6 = arith.andi %4, %5 : vector<1x290xi32>
    %c0_i32 = arith.constant 0 : i32
    %7 = vector.broadcast %c0_i32 : i32 to vector<1x290xi32>
    %8 = arith.cmpi sgt, %6, %7 : vector<1x290xi32>
    %c15_i32_3 = arith.constant 15 : i32
    %9 = vector.broadcast %c15_i32_3 : i32 to vector<1x290xi32>
    %10 = arith.cmpi slt, %6, %9 : vector<1x290xi32>
    %11 = tpu.iota {dimensions = array<i32: 1>} : vector<1x256xi32>
    %c15_i32_4 = arith.constant 15 : i32
    %12 = vector.broadcast %c15_i32_4 : i32 to vector<1x256xi32>
    %13 = arith.andi %11, %12 : vector<1x256xi32>
    %c0_i32_5 = arith.constant 0 : i32
    %14 = vector.broadcast %c0_i32_5 : i32 to vector<1x256xi32>
    %15 = arith.cmpi sgt, %13, %14 : vector<1x256xi32>
    %c15_i32_6 = arith.constant 15 : i32
    %16 = vector.broadcast %c15_i32_6 : i32 to vector<1x256xi32>
    %17 = arith.cmpi slt, %13, %16 : vector<1x256xi32>
    %18 = vector.extract_strided_slice %1 {offsets = [0, 0], sizes = [8, 290], strides = [1, 1]} : vector<8x384xf32> to vector<8x290xf32>
    %cst = arith.constant 0.000000e+00 : f32
    %19 = vector.shape_cast %8 : vector<1x290xi1> to vector<1x290xi1>
    %20 = vector.broadcast %19 : vector<1x290xi1> to vector<8x290xi1>
    %21 = vector.broadcast %cst : f32 to vector<8x290xf32>
    %22 = arith.select %20, %18, %21 : vector<8x290xi1>, vector<8x290xf32>
    %23 = vector.extract_strided_slice %1 {offsets = [0, 1], sizes = [8, 290], strides = [1, 1]} : vector<8x384xf32> to vector<8x290xf32>
    %24 = vector.extract_strided_slice %1 {offsets = [0, 2], sizes = [8, 290], strides = [1, 1]} : vector<8x384xf32> to vector<8x290xf32>
    %cst_7 = arith.constant 0.000000e+00 : f32
    %25 = vector.shape_cast %10 : vector<1x290xi1> to vector<1x290xi1>
    %26 = vector.broadcast %25 : vector<1x290xi1> to vector<8x290xi1>
    %27 = vector.broadcast %cst_7 : f32 to vector<8x290xf32>
    %28 = arith.select %26, %24, %27 : vector<8x290xi1>, vector<8x290xf32>
    %29 = vector.extract_strided_slice %1 {offsets = [0, 16], sizes = [8, 290], strides = [1, 1]} : vector<8x384xf32> to vector<8x290xf32>
    %cst_8 = arith.constant 0.000000e+00 : f32
    %30 = vector.shape_cast %8 : vector<1x290xi1> to vector<1x290xi1>
    %31 = vector.broadcast %30 : vector<1x290xi1> to vector<8x290xi1>
    %32 = vector.broadcast %cst_8 : f32 to vector<8x290xf32>
    %33 = arith.select %31, %29, %32 : vector<8x290xi1>, vector<8x290xf32>
    %34 = vector.extract_strided_slice %1 {offsets = [0, 17], sizes = [8, 290], strides = [1, 1]} : vector<8x384xf32> to vector<8x290xf32>
    %35 = vector.extract_strided_slice %1 {offsets = [0, 18], sizes = [8, 290], strides = [1, 1]} : vector<8x384xf32> to vector<8x290xf32>
    %cst_9 = arith.constant 0.000000e+00 : f32
    %36 = vector.shape_cast %10 : vector<1x290xi1> to vector<1x290xi1>
    %37 = vector.broadcast %36 : vector<1x290xi1> to vector<8x290xi1>
    %38 = vector.broadcast %cst_9 : f32 to vector<8x290xf32>
    %39 = arith.select %37, %35, %38 : vector<8x290xi1>, vector<8x290xf32>
    %40 = vector.extract_strided_slice %1 {offsets = [0, 32], sizes = [8, 290], strides = [1, 1]} : vector<8x384xf32> to vector<8x290xf32>
    %cst_10 = arith.constant 0.000000e+00 : f32
    %41 = vector.shape_cast %8 : vector<1x290xi1> to vector<1x290xi1>
    %42 = vector.broadcast %41 : vector<1x290xi1> to vector<8x290xi1>
    %43 = vector.broadcast %cst_10 : f32 to vector<8x290xf32>
    %44 = arith.select %42, %40, %43 : vector<8x290xi1>, vector<8x290xf32>
    %45 = vector.extract_strided_slice %1 {offsets = [0, 33], sizes = [8, 290], strides = [1, 1]} : vector<8x384xf32> to vector<8x290xf32>
    %46 = vector.extract_strided_slice %1 {offsets = [0, 34], sizes = [8, 290], strides = [1, 1]} : vector<8x384xf32> to vector<8x290xf32>
    %cst_11 = arith.constant 0.000000e+00 : f32
    %47 = vector.shape_cast %10 : vector<1x290xi1> to vector<1x290xi1>
    %48 = vector.broadcast %47 : vector<1x290xi1> to vector<8x290xi1>
    %49 = vector.broadcast %cst_11 : f32 to vector<8x290xf32>
    %50 = arith.select %48, %46, %49 : vector<8x290xi1>, vector<8x290xf32>
    %51 = tpu.concatenate %22, %23, %28, %33, %34, %39, %44, %45, %50 in 0 : vector<8x290xf32>, vector<8x290xf32>, vector<8x290xf32>, vector<8x290xf32>, vector<8x290xf32>, vector<8x290xf32>, vector<8x290xf32>, vector<8x290xf32>, vector<8x290xf32> -> vector<72x290xf32>
    %c0_12 = arith.constant 0 : index
    %c0_13 = arith.constant 0 : index
    %52 = vector.load %arg3[%c0_12, %c0_13] : memref<8x72xf32, #tpu.memory_space<vmem>>, vector<8x72xf32>
    %cst_14 = arith.constant dense<0.000000e+00> : vector<8x290xf32>
    %53 = tpu.matmul %52, %51, %cst_14 {dimension_numbers = #tpu.dot_dimension_numbers<[1], [0], [0], [1], [0, 0, 1, 1], [], []>, precision = #tpu.contract_precision<fp32>} : vector<8x72xf32>, vector<72x290xf32>, vector<8x290xf32> -> vector<8x290xf32>
    %c0_15 = arith.constant 0 : index
    %c0_16 = arith.constant 0 : index
    %54 = vector.load %arg4[%c0_15, %c0_16] : memref<8x1xf32, #tpu.memory_space<vmem>>, vector<8x1xf32>
    %55 = vector.broadcast %54 : vector<8x1xf32> to vector<8x290xf32>
    %56 = arith.addf %53, %55 : vector<8x290xf32>
    %cst_17 = arith.constant 0.000000e+00 : f32
    %57 = vector.broadcast %cst_17 : f32 to vector<8x290xf32>
    %58 = arith.cmpf ogt, %56, %57 : vector<8x290xf32>
    %cst_18 = arith.constant 0.00999999977 : f32
    %59 = vector.broadcast %cst_18 : f32 to vector<8x290xf32>
    %60 = arith.mulf %59, %56 : vector<8x290xf32>
    %61 = arith.select %58, %56, %60 : vector<8x290xi1>, vector<8x290xf32>
    %c1_i32_19 = arith.constant 1 : i32
    %62 = vector.broadcast %c1_i32_19 : i32 to vector<1x290xi32>
    %63 = arith.cmpi sge, %2, %62 : vector<1x290xi32>
    %c288_i32 = arith.constant 288 : i32
    %64 = vector.broadcast %c288_i32 : i32 to vector<1x290xi32>
    %65 = arith.cmpi sle, %2, %64 : vector<1x290xi32>
    %66 = arith.andi %63, %65 : vector<1x290xi1>
    %c0_i32_20 = arith.constant 0 : i32
    %67 = arith.cmpi sgt, %arg1, %c0_i32_20 : i32
    %c17_i32 = arith.constant 17 : i32
    %68 = vector.broadcast %c17_i32 : i32 to vector<1x290xi32>
    %69 = arith.cmpi sge, %2, %68 : vector<1x290xi32>
    %70 = vector.broadcast %67 : i1 to vector<1x290xi1>
    %71 = arith.ori %70, %69 : vector<1x290xi1>
    %72 = arith.andi %66, %71 : vector<1x290xi1>
    %c0_i32_21 = arith.constant 0 : i32
    %73 = arith.cmpi slt, %arg1, %c0_i32_21 : i32
    %c273_i32 = arith.constant 273 : i32
    %74 = vector.broadcast %c273_i32 : i32 to vector<1x290xi32>
    %75 = arith.cmpi slt, %2, %74 : vector<1x290xi32>
    %76 = vector.broadcast %73 : i1 to vector<1x290xi1>
    %77 = arith.ori %76, %75 : vector<1x290xi1>
    %78 = arith.andi %72, %77 : vector<1x290xi1>
    %cst_22 = arith.constant 0.000000e+00 : f32
    %79 = vector.shape_cast %78 : vector<1x290xi1> to vector<1x290xi1>
    %80 = vector.broadcast %79 : vector<1x290xi1> to vector<8x290xi1>
    %81 = vector.broadcast %cst_22 : f32 to vector<8x290xf32>
    %82 = arith.select %80, %61, %81 : vector<8x290xi1>, vector<8x290xf32>
    %83 = vector.extract_strided_slice %82 {offsets = [0, 0], sizes = [8, 256], strides = [1, 1]} : vector<8x290xf32> to vector<8x256xf32>
    %cst_23 = arith.constant 0.000000e+00 : f32
    %84 = vector.shape_cast %15 : vector<1x256xi1> to vector<1x256xi1>
    %85 = vector.broadcast %84 : vector<1x256xi1> to vector<8x256xi1>
    %86 = vector.broadcast %cst_23 : f32 to vector<8x256xf32>
    %87 = arith.select %85, %83, %86 : vector<8x256xi1>, vector<8x256xf32>
    %88 = vector.extract_strided_slice %82 {offsets = [0, 1], sizes = [8, 256], strides = [1, 1]} : vector<8x290xf32> to vector<8x256xf32>
    %89 = vector.extract_strided_slice %82 {offsets = [0, 2], sizes = [8, 256], strides = [1, 1]} : vector<8x290xf32> to vector<8x256xf32>
    %cst_24 = arith.constant 0.000000e+00 : f32
    %90 = vector.shape_cast %17 : vector<1x256xi1> to vector<1x256xi1>
    %91 = vector.broadcast %90 : vector<1x256xi1> to vector<8x256xi1>
    %92 = vector.broadcast %cst_24 : f32 to vector<8x256xf32>
    %93 = arith.select %91, %89, %92 : vector<8x256xi1>, vector<8x256xf32>
    %94 = vector.extract_strided_slice %82 {offsets = [0, 16], sizes = [8, 256], strides = [1, 1]} : vector<8x290xf32> to vector<8x256xf32>
    %cst_25 = arith.constant 0.000000e+00 : f32
    %95 = vector.shape_cast %15 : vector<1x256xi1> to vector<1x256xi1>
    %96 = vector.broadcast %95 : vector<1x256xi1> to vector<8x256xi1>
    %97 = vector.broadcast %cst_25 : f32 to vector<8x256xf32>
    %98 = arith.select %96, %94, %97 : vector<8x256xi1>, vector<8x256xf32>
    %99 = vector.extract_strided_slice %82 {offsets = [0, 17], sizes = [8, 256], strides = [1, 1]} : vector<8x290xf32> to vector<8x256xf32>
    %100 = vector.extract_strided_slice %82 {offsets = [0, 18], sizes = [8, 256], strides = [1, 1]} : vector<8x290xf32> to vector<8x256xf32>
    %cst_26 = arith.constant 0.000000e+00 : f32
    %101 = vector.shape_cast %17 : vector<1x256xi1> to vector<1x256xi1>
    %102 = vector.broadcast %101 : vector<1x256xi1> to vector<8x256xi1>
    %103 = vector.broadcast %cst_26 : f32 to vector<8x256xf32>
    %104 = arith.select %102, %100, %103 : vector<8x256xi1>, vector<8x256xf32>
    %105 = vector.extract_strided_slice %82 {offsets = [0, 32], sizes = [8, 256], strides = [1, 1]} : vector<8x290xf32> to vector<8x256xf32>
    %cst_27 = arith.constant 0.000000e+00 : f32
    %106 = vector.shape_cast %15 : vector<1x256xi1> to vector<1x256xi1>
    %107 = vector.broadcast %106 : vector<1x256xi1> to vector<8x256xi1>
    %108 = vector.broadcast %cst_27 : f32 to vector<8x256xf32>
    %109 = arith.select %107, %105, %108 : vector<8x256xi1>, vector<8x256xf32>
    %110 = vector.extract_strided_slice %82 {offsets = [0, 33], sizes = [8, 256], strides = [1, 1]} : vector<8x290xf32> to vector<8x256xf32>
    %111 = vector.extract_strided_slice %82 {offsets = [0, 34], sizes = [8, 256], strides = [1, 1]} : vector<8x290xf32> to vector<8x256xf32>
    %cst_28 = arith.constant 0.000000e+00 : f32
    %112 = vector.shape_cast %17 : vector<1x256xi1> to vector<1x256xi1>
    %113 = vector.broadcast %112 : vector<1x256xi1> to vector<8x256xi1>
    %114 = vector.broadcast %cst_28 : f32 to vector<8x256xf32>
    %115 = arith.select %113, %111, %114 : vector<8x256xi1>, vector<8x256xf32>
    %116 = tpu.concatenate %87, %88, %93, %98, %99, %104, %109, %110, %115 in 0 : vector<8x256xf32>, vector<8x256xf32>, vector<8x256xf32>, vector<8x256xf32>, vector<8x256xf32>, vector<8x256xf32>, vector<8x256xf32>, vector<8x256xf32>, vector<8x256xf32> -> vector<72x256xf32>
    %c0_29 = arith.constant 0 : index
    %c0_30 = arith.constant 0 : index
    %117 = vector.load %arg5[%c0_29, %c0_30] : memref<8x72xf32, #tpu.memory_space<vmem>>, vector<8x72xf32>
    %cst_31 = arith.constant dense<0.000000e+00> : vector<8x256xf32>
    %118 = tpu.matmul %117, %116, %cst_31 {dimension_numbers = #tpu.dot_dimension_numbers<[1], [0], [0], [1], [0, 0, 1, 1], [], []>, precision = #tpu.contract_precision<fp32>} : vector<8x72xf32>, vector<72x256xf32>, vector<8x256xf32> -> vector<8x256xf32>
    %c0_32 = arith.constant 0 : index
    %c0_33 = arith.constant 0 : index
    %119 = vector.load %arg6[%c0_32, %c0_33] : memref<8x1xf32, #tpu.memory_space<vmem>>, vector<8x1xf32>
    %120 = vector.broadcast %119 : vector<8x1xf32> to vector<8x256xf32>
    %121 = arith.addf %118, %120 : vector<8x256xf32>
    %cst_34 = arith.constant 0.000000e+00 : f32
    %122 = vector.broadcast %cst_34 : f32 to vector<8x256xf32>
    %123 = arith.cmpf ogt, %121, %122 : vector<8x256xf32>
    %cst_35 = arith.constant 0.00999999977 : f32
    %124 = vector.broadcast %cst_35 : f32 to vector<8x256xf32>
    %125 = arith.mulf %124, %121 : vector<8x256xf32>
    %126 = arith.select %123, %121, %125 : vector<8x256xi1>, vector<8x256xf32>
    %127 = vector.extract_strided_slice %1 {offsets = [0, 34], sizes = [8, 256], strides = [1, 1]} : vector<8x384xf32> to vector<8x256xf32>
    %c0_36 = arith.constant 0 : index
    %c0_37 = arith.constant 0 : index
    %128 = vector.load %arg7[%c0_36, %c0_37] : memref<8x8xf32, #tpu.memory_space<vmem>>, vector<8x8xf32>
    %cst_38 = arith.constant dense<0.000000e+00> : vector<8x256xf32>
    %129 = tpu.matmul %128, %127, %cst_38 {dimension_numbers = #tpu.dot_dimension_numbers<[1], [0], [0], [1], [0, 0, 1, 1], [], []>, precision = #tpu.contract_precision<fp32>} : vector<8x8xf32>, vector<8x256xf32>, vector<8x256xf32> -> vector<8x256xf32>
    %c0_39 = arith.constant 0 : index
    %c0_40 = arith.constant 0 : index
    %130 = vector.load %arg8[%c0_39, %c0_40] : memref<8x1xf32, #tpu.memory_space<vmem>>, vector<8x1xf32>
    %131 = vector.broadcast %130 : vector<8x1xf32> to vector<8x256xf32>
    %132 = arith.addf %129, %131 : vector<8x256xf32>
    %133 = arith.addf %126, %132 : vector<8x256xf32>
    %c0_41 = arith.constant 0 : index
    %c0_42 = arith.constant 0 : index
    %c0_43 = arith.constant 0 : index
    %134 = vector.load %arg9[%c0_41, %c0_42, %c0_43] : memref<1x8x256xf32, #tpu.memory_space<vmem>>, vector<1x8x256xf32>
    %135 = vector.shape_cast %134 : vector<1x8x256xf32> to vector<8x256xf32>
    %136 = vector.shape_cast %133 : vector<8x256xf32> to vector<1x8x256xf32>
    tpu.vector_store %arg9[%c0_41, %c0_42, %c0_43], %136 {strides = array<i32>} : memref<1x8x256xf32, #tpu.memory_space<vmem>>, vector<1x8x256xf32>,
    return
  }
  func.func @transform_0(%arg0: i32, %arg1: i32) -> (i32, i32, i32, i32) {
    %c0_i32 = arith.constant 0 : i32
    %c0_i32_0 = arith.constant 0 : i32
    %c0_i32_1 = arith.constant 0 : i32
    return %arg0, %arg1, %c0_i32, %c0_i32_0 : i32, i32, i32, i32
  }
  func.func @transform_1(%arg0: i32, %arg1: i32) -> (i32, i32) {
    %c0_i32 = arith.constant 0 : i32
    %c0_i32_0 = arith.constant 0 : i32
    %c0_i32_1 = arith.constant 0 : i32
    return %c0_i32, %c0_i32_0 : i32, i32
  }
  func.func @transform_2(%arg0: i32, %arg1: i32) -> (i32, i32) {
    %c0_i32 = arith.constant 0 : i32
    %c0_i32_0 = arith.constant 0 : i32
    %c0_i32_1 = arith.constant 0 : i32
    return %c0_i32, %c0_i32_0 : i32, i32
  }
  func.func @transform_3(%arg0: i32, %arg1: i32) -> (i32, i32) {
    %c0_i32 = arith.constant 0 : i32
    %c0_i32_0 = arith.constant 0 : i32
    %c0_i32_1 = arith.constant 0 : i32
    return %c0_i32, %c0_i32_0 : i32, i32
  }
  func.func @transform_4(%arg0: i32, %arg1: i32) -> (i32, i32) {
    %c0_i32 = arith.constant 0 : i32
    %c0_i32_0 = arith.constant 0 : i32
    %c0_i32_1 = arith.constant 0 : i32
    return %c0_i32, %c0_i32_0 : i32, i32
  }
  func.func @transform_5(%arg0: i32, %arg1: i32) -> (i32, i32) {
    %c0_i32 = arith.constant 0 : i32
    %c0_i32_0 = arith.constant 0 : i32
    %c0_i32_1 = arith.constant 0 : i32
    return %c0_i32, %c0_i32_0 : i32, i32
  }
  func.func @transform_6(%arg0: i32, %arg1: i32) -> (i32, i32) {
    %c0_i32 = arith.constant 0 : i32
    %c0_i32_0 = arith.constant 0 : i32
    %c0_i32_1 = arith.constant 0 : i32
    return %c0_i32, %c0_i32_0 : i32, i32
  }
  func.func @transform_7(%arg0: i32, %arg1: i32) -> (i32, i32, i32) {
    %c0_i32 = arith.constant 0 : i32
    %c0_i32_0 = arith.constant 0 : i32
    return %arg0, %c0_i32, %arg1 : i32, i32, i32
  }
}

</mosaic_0001>

<bundles_post_ra>
// kernel: _conv_block_impl.1
= control target key start
LH: loop header
LB: loop body
LE: loop exit
PB: predicated region body
PF: predicated region fallthrough
CT: control target
= control target key end

     0   :  { %s2423_s24 = smov 0   ;;  %s2425_s25 = smov 0   ;;  %s3522_s0 = inlined_call_operand.vmem [shape: f32[2,1,8,384], index: 0, kind: input, shape index: {}]   ;;  %s3523_s1 = inlined_call_operand.vmem [shape: f32[8,72], index: 1, kind: input, shape index: {}]   ;;  %s3524_s2 = inlined_call_operand.vmem [shape: f32[8,1], index: 2, kind: input, shape index: {}]   ;;  %s3525_s3 = inlined_call_operand.vmem [shape: f32[8,72], index: 3, kind: input, shape index: {}]   ;;  %s3526_s4 = inlined_call_operand.vmem [shape: f32[8,1], index: 4, kind: input, shape index: {}]   ;;  %s3527_s5 = inlined_call_operand.vmem [shape: f32[8,8], index: 5, kind: input, shape index: {}]   ;;  %s3528_s6 = inlined_call_operand.vmem [shape: f32[8,1], index: 6, kind: input, shape index: {}]   ;;  %s3529_s7 = inlined_call_operand.vmem [shape: f32[2,8,256], index: 7, kind: output, shape index: {}]  }
   0x1   :  { %s2427_s26 = smov 0  }
   0x2 LB: > { %s29_s27 = sadd.s32 1, %s2368_s25  ;;  %p2304_p0 = scmp.ge.s32.totalorder %s2372_s26, 1  ;;  %s2372_s26 = sphi %s2427_s26, %s17_s26   ;;  %s2368_s25 = sphi %s2425_s25, %s3571_s25   ;;  %s2364_s24 = sphi %s2423_s24, %s3570_s24  }
   0x3   : > { %p31_p1 = scmp.ge.s32.totalorder %s29_s27, 2  ;;  %p257_p2 = scmp.lt.s32.totalorder %s2372_s26, 3 }
   0x5   : > { %s3573_s27 = smov (%p31_p1, %s29_s27), 0  ;;  %p258_p3 = pnand %p2304_p0, %p257_p2 }
   0x6   : > { %p297_p4 = scmp.lt.s32.totalorder (!%p258_p3), %s2364_s24, 1  ;;  %s2374_s9 = smov (!%p258_p3), 96  }
   0x7   : > { %261 = sbr.rel (%p258_p3) target bundleno = 729 (0x2d9), region = 48  ;;  %s2375_s10 = smov (!%p258_p3), 95  }
   0x8   : > { %s2376_s11 = smov (!%p258_p3), 94   ;;  %s2377_s12 = smov (!%p258_p3), 110  }
   0x9   : > { %s2378_s13 = smov (!%p258_p3), 112   ;;  %s2379_s14 = smov (!%p258_p3), 111  }
   0xa   : > { %s2380_s15 = smov (!%p258_p3), 126   ;;  %s2381_s16 = smov (!%p258_p3), 127  }
   0xc   : > { %s3575_s24 = smov (!%p297_p4, %s2364_s24), 1  ;;  %v319_v4 = vlaneseq  ;;  %vm410_vm0 = vcmask 785408   ;;  %vm464_vm2 = vcmask 777216   ;;  %vm425_vm3 = vcmask 769024  }
   0xd   : > { %s2314_s28 = smul.u32 24, %s3575_s24  ;;  %vm395_vm5 = vcmask 900096   ;;  %vm452_vm6 = vcmask 908288   ;;  %vm380_vm7 = vcmask 916480   ;;  %vm365_vm10 = vcmask 1031168  }
   0xe   : > { %v2503_v6 = vand.u32 127, %v319_v4  ;;  %vm477_vm11 = vcmask 588800   ;;  %vm440_vm12 = vcmask 1039360  }
   0xf   : > { %s305_s8 = scalar_lea.vmem %s3522_s0, %s2314_s28 }
  0x10   : > { %v2447_v0 = vld [vmem:[%s305_s8] sm:$0xff]  ;;  %v2455_v1 = vld [vmem:[%s305_s8 + $0x8] sm:$0xff]  ;;  %v2463_v2 = vld [vmem:[%s305_s8 + $0x10] sm:$0xff]  ;;  %v2308_v7 = vadd.s32 4294967295, %v2503_v6  ;;  %v2570_v38 = vadd.s32 128, %v2503_v6  ;;  %vm1240_vm15 = vcmp.ge.s32.totalorder %v2503_v6, 1 }
  0x11   : > { %404 = vrot.lane.b32.xlu2 %v2447_v0, %s2374_s9  ;;  %458 = vrot.lane.b32.xlu1 %v2447_v0, %s2375_s10 }
  0x12   : > { %419 = vrot.lane.b32.xlu0 %v2447_v0, %s2376_s11  ;;  %v326_v8 = vand.u32 15, %v2308_v7  ;;  %v2309_v44 = vadd.s32 4294967295, %v2570_v38 }
  0x14   : > { %vm2508_vm1 = vcmp.gt.s32.totalorder %v326_v8, 0  ;;  %vm2522_vm4 = vcmp.lt.s32.totalorder %v326_v8, 15  ;;  %v327_v52 = vand.u32 15, %v2309_v44  ;;  %v470_v44 = vld [vmem:[%s3523_s1] sm:$0xff] }
  0x15   : > { %v347_v8 = vsel %vm2508_vm1, %v2447_v0, 0.0  ;;  %v479_v18 = vsel %vm477_vm11, %v470_v44, 0 }
  0x16   : > { %vm2601_vm8 = vcmp.lt.s32.totalorder %v327_v52, 15  ;;  %vm2643_vm9 = vcmp.gt.s32.totalorder %v327_v52, 0 }
  0x19   : > { %406 = vrot.lane.b32.xlu2 %v2455_v1, %s2374_s9  ;;  %460 = vrot.lane.b32.xlu1 %v2455_v1, %s2375_s10 }
  0x1a   : > { %421 = vrot.lane.b32.xlu0 %v2455_v1, %s2376_s11 }
  0x21   : > { %423 = vrot.lane.b32.xlu2 %v2463_v2, %s2376_s11  ;;  %391 = vrot.lane.b32.xlu1 %v2455_v1, %s2377_s12 }
  0x22   : > { %389 = vrot.lane.b32.xlu0 %v2447_v0, %s2377_s12 }
  0x29   : > { %374 = vrot.lane.b32.xlu2 %v2447_v0, %s2378_s13  ;;  %448 = vrot.lane.b32.xlu1 %v2455_v1, %s2379_s14 }
  0x2a   : > { %446 = vrot.lane.b32.xlu0 %v2447_v0, %s2379_s14 }
  0x31   : > { %359 = vrot.lane.b32.xlu2 %v2447_v0, %s2380_s15  ;;  %462 = vrot.lane.b32.xlu1 %v2463_v2, %s2375_s10 }
  0x32   : > { %376 = vrot.lane.b32.xlu0 %v2455_v1, %s2378_s13 }
  0x39   : > { %393 = vrot.lane.b32.xlu2 %v2463_v2, %s2377_s12  ;;  %408 = vrot.lane.b32.xlu1 %v2463_v2, %s2374_s9 }
  0x3a   : > { %361 = vrot.lane.b32.xlu0 %v2455_v1, %s2380_s15 }
  0x41   : > { %450 = vrot.lane.b32.xlu2 %v2463_v2, %s2379_s14  ;;  %436 = vrot.lane.b32.xlu1 %v2455_v1, %s2381_s16 }
  0x42   : > { %434 = vrot.lane.b32.xlu0 %v2447_v0, %s2381_s16 }
  0x49   : > { %363 = vrot.lane.b32.xlu1 %v2463_v2, %s2380_s15  ;;  %438 = vrot.lane.b32.xlu2 %v2463_v2, %s2381_s16 }
  0x4a   : > { %378 = vrot.lane.b32.xlu0 %v2463_v2, %s2378_s13 }
  0x6b   : > { %v405_v3 = vpop.permute.xlu2 %404 }
  0x73   : > { %v2501_v5 = vpop.permute.xlu2 %406 }
  0x74   : > { %v411_v13 = vsel %vm410_vm0, %v405_v3, %v2501_v5 }
  0x75   : > { %v416_v14 = vsel %vm2508_vm1, %v411_v13, 0.0 }
  0x76   : > { %v2516_v15 = vand.u32 4294901760, %v416_v14 }
  0x78   : > { %v2537_v24 = vsub.f32 %v416_v14, %v2516_v15 }
  0x7a   : > { %v536_v31 = vand.u32 4294901760, %v2537_v24 }
  0x7b   : > { %v2506_v9 = vpop.permute.xlu2 %423 }
  0x7c   : > { %v537_v41 = vsub.f32 %v2537_v24, %v536_v31 }
  0x7e   : > { %v538_v46 = vand.u32 4294901760, %v537_v41 }
  0x83   : > { %v459_v10 = vpop.permute.xlu1 %458  ;;  %v2518_v16 = vpop.permute.xlu2 %374 }
  0x84   : > { %v420_v11 = vpop.permute.xlu0 %419 }
  0x8b   : > { %v2520_v17 = vpop.permute.xlu1 %460  ;;  %v2555_v33 = vpop.permute.xlu2 %359 }
  0x8c   : > { %v465_v19 = vsel %vm464_vm2, %v459_v10, %v2520_v17  ;;  %v422_v20 = vpop.permute.xlu0 %421 }
  0x8d   : > { %v2528_v21 = vand.u32 4294901760, %v465_v19  ;;  %v2531_v22 = vsel %vm425_vm3, %v420_v11, %v422_v20  ;;  %v2607_v58 = vsel %vm425_vm3, %v422_v20, %v2506_v9  ;;  %v2653_v20 = vand.u32 4294901760, %v347_v8 }
  0x8e   : > { %v431_v23 = vsel %vm2522_vm4, %v2531_v22, 0.0  ;;  %v432_v63 = vsel %vm2601_vm8, %v2607_v58, 0.0 }
  0x8f   : > { %v2540_v25 = vsub.f32 %v465_v19, %v2528_v21  ;;  %v2542_v26 = vand.u32 4294901760, %v431_v23  ;;  %v2631_v11 = vand.u32 4294901760, %v432_v63 }
  0x91   : > { %489 = vmatpush.msra.mxu0 %v2542_v26  ;;  %629 = vmatpush.msra.mxu3 %v2542_v26  ;;  %v2547_v27 = vsub.f32 %v431_v23, %v2542_v26  ;;  %v530_v28 = vand.u32 4294901760, %v2540_v25 }
  0x93   : > { %491 = vmatpush.msra.mxu0 %v2528_v21  ;;  %590 = vmatpush.msra.mxu2 %v2547_v27  ;;  %v392_v29 = vpop.permute.xlu1 %391  ;;  %v524_v30 = vand.u32 4294901760, %v2547_v27  ;;  %v531_v36 = vsub.f32 %v2540_v25, %v530_v28  ;;  %v2592_v53 = vpop.permute.xlu2 %393 }
  0x94   : > { %631 = vmatpush.msra.mxu3 %v2528_v21  ;;  %v390_v32 = vpop.permute.xlu0 %389  ;;  %v397_v10 = vsel %vm395_vm5, %v392_v29, %v2592_v53 }
  0x95   : > { %v396_v34 = vsel %vm395_vm5, %v390_v32, %v392_v29  ;;  %493 = vmatpush.msra.mxu0 %v2516_v15  ;;  %593 = vmatpush.msra.mxu2 %v2540_v25  ;;  %v525_v35 = vsub.f32 %v2547_v27, %v524_v30  ;;  %v532_v43 = vand.u32 4294901760, %v531_v36  ;;  %v402_v12 = vsel %vm2601_vm8, %v397_v10, 0.0 }
  0x96   : > { %v401_v37 = vsel %vm2522_vm4, %v396_v34, 0.0  ;;  %633 = vmatpush.msra.mxu3 %v2516_v15  ;;  %v2675_v41 = vand.u32 4294901760, %v402_v12 }
  0x97   : > { %v2572_v39 = vand.u32 4294901760, %v401_v37  ;;  %596 = vmatpush.msra.mxu2 %v2537_v24  ;;  %v526_v40 = vand.u32 4294901760, %v525_v35  ;;  %v2665_v35 = vsub.f32 %v432_v63, %v2631_v11 }
  0x99   : > { %v2579_v42 = vsub.f32 %v401_v37, %v2572_v39  ;;  %495 = vmatpush.msra.mxu0 %v2572_v39  ;;  %527 = vmatpush.msra.mxu1 %v526_v40 }
  0x9a   : > { %635 = vmatpush.msra.mxu3 %v2572_v39 }
  0x9b   : > { %533 = vmatpush.msra.mxu1 %v532_v43  ;;  %599 = vmatpush.msra.mxu2 %v2579_v42  ;;  %v449_v45 = vpop.permute.xlu1 %448  ;;  %v3537_v47 = vand.u32 4294901760, %v2579_v42  ;;  %v2633_v13 = vpop.permute.xlu2 %450  ;;  %v3548_v24 = vand.u32 4294901760, %v2579_v42 }
  0x9c   : > { %v447_v48 = vpop.permute.xlu0 %446  ;;  %v454_v23 = vsel %vm452_vm6, %v449_v45, %v2633_v13 }
  0x9d   : > { %v453_v49 = vsel %vm452_vm6, %v447_v48, %v449_v45  ;;  %539 = vmatpush.msra.mxu1 %v538_v46  ;;  %v543_v50 = vsub.f32 %v2579_v42, %v3537_v47  ;;  %v2684_v45 = vand.u32 4294901760, %v454_v23  ;;  %v2689_v48 = vsub.f32 %v347_v8, %v2653_v20 }
  0x9e   : > { %v2590_v51 = vand.u32 4294901760, %v453_v49 }
  0x9f   : > { %v544_v54 = vand.u32 4294901760, %v543_v50 }
  0xa0   : > { %v2595_v55 = vsub.f32 %v453_v49, %v2590_v51  ;;  %497 = vmatpush.msra.mxu0 %v2590_v51  ;;  %637 = vmatpush.msra.mxu3 %v2590_v51 }
  0xa1   : > { %545 = vmatpush.msra.mxu1 %v544_v54  ;;  %v3532_v54 = vand.u32 4294901760, %v2665_v35 }
  0xa2   : > { %602 = vmatpush.msra.mxu2 %v2595_v55  ;;  %v3536_v56 = vand.u32 4294901760, %v2595_v55 }
  0xa3   : > { %v2609_v59 = vpop.permute.xlu1 %462 }
  0xa4   : > { %v2611_v60 = vpop.permute.xlu0 %376  ;;  %v549_v61 = vsub.f32 %v2595_v55, %v3536_v56  ;;  %v466_v14 = vsel %vm464_vm2, %v2520_v17, %v2609_v59 }
  0xa5   : > { %v381_v62 = vsel %vm380_vm7, %v2518_v16, %v2611_v60  ;;  %v2657_v29 = vand.u32 4294901760, %v466_v14 }
  0xa6   : > { %v386_v3 = vsel %vm2508_vm1, %v381_v62, 0.0  ;;  %v550_v4 = vand.u32 4294901760, %v549_v61  ;;  %v2705_v61 = vsub.f32 %v402_v12, %v2675_v41  ;;  %v2708_v62 = vsub.f32 %v454_v23, %v2684_v45 }
  0xa7   : > { %v2624_v7 = vand.u32 4294901760, %v386_v3  ;;  %v2692_v49 = vsub.f32 %v466_v14, %v2657_v29  ;;  %v2714_v14 = vand.u32 4294901760, %v479_v18  ;;  %vm1250_vm1 = vcmp.ge.s32.totalorder %v2503_v6, 17 }
  0xa8   : > { %551 = vmatpush.msra.mxu1 %v550_v4  ;;  %v3533_v4 = vand.u32 4294901760, %v2689_v48  ;;  %v3539_v44 = vand.u32 4294901760, %v2705_v61 }
  0xa9   : > { %v2639_v16 = vsub.f32 %v386_v3, %v2624_v7  ;;  %499 = vmatpush.msra.mxu0 %v2624_v7  ;;  %639 = vmatpush.msra.mxu3 %v2624_v7  ;;  %v3534_v10 = vand.u32 4294901760, %v2692_v49 }
  0xab   : > { %605 = vmatpush.msra.mxu2 %v2639_v16  ;;  %v2650_v19 = vpop.permute.xlu1 %408  ;;  %v3531_v17 = vand.u32 4294901760, %v2639_v16 }
  0xac   : > { %v412_v32 = vsel %vm410_vm0, %v2501_v5, %v2650_v19  ;;  %v2662_v34 = vpop.permute.xlu0 %361 }
  0xad   : > { %v417_v36 = vsel %vm2643_vm9, %v412_v32, 0.0  ;;  %v366_v37 = vsel %vm365_vm10, %v2555_v33, %v2662_v34  ;;  %v555_v40 = vsub.f32 %v2639_v16, %v3531_v17 }
  0xae   : > { %v2677_v43 = vand.u32 4294901760, %v417_v36  ;;  %v371_v5 = vsel %vm2522_vm4, %v366_v37, 0.0 }
  0xaf   : > { %v2686_v46 = vand.u32 4294901760, %v371_v5  ;;  %v556_v33 = vand.u32 4294901760, %v555_v40  ;;  %v2726_v40 = vpop.permute.xlu2 %438 }
  0xb0   : > { %v2700_v52 = vsub.f32 %v417_v36, %v2677_v43  ;;  %v775_v36 = vsub.f32 %v2665_v35, %v3532_v54  ;;  %v2742_v54 = vsub.f32 %v479_v18, %v2714_v14 }
  0xb1   : > { %v2695_v50 = vsub.f32 %v371_v5, %v2686_v46  ;;  %501 = vmatpush.msra.mxu0 %v2686_v46  ;;  %557 = vmatpush.msra.mxu1 %v556_v33  ;;  %v573_v33 = vsub.f32 %v2689_v48, %v3533_v4  ;;  %v348_v4 = vsel %vm2643_vm9, %v2455_v1, 0.0 }
  0xb2   : > { %641 = vmatpush.msra.mxu3 %v2686_v46  ;;  %v3535_v37 = vand.u32 4294901760, %v2700_v52  ;;  %v2774_v47 = vand.u32 4294901760, %v2742_v54 }
  0xb3   : > { %608 = vmatpush.msra.mxu2 %v2695_v50  ;;  %v437_v63 = vpop.permute.xlu1 %436  ;;  %v3530_v3 = vand.u32 4294901760, %v2695_v50 }
  0xb4   : > { %v435_v8 = vpop.permute.xlu0 %434 }
  0xb5   : > { %v441_v32 = vsel %vm440_vm12, %v435_v8, %v437_v63  ;;  %v561_v12 = vsub.f32 %v2695_v50, %v3530_v3  ;;  %v3538_v8 = vand.u32 4294901760, %v2708_v62  ;;  %v2382_v3 = vmov 0  }
  0xb6   : > { %v2720_v23 = vand.u32 4294901760, %v441_v32  ;;  %2348 = vset.pattern.permute.xlu0 %v2382_v3  ;;  %2349 = vset.pattern.permute.xlu2 %v2382_v3  ;;  %v442_v3 = vsel %vm440_vm12, %v437_v63, %v2726_v40  ;;  %v793_v63 = vsub.f32 %v2705_v61, %v3539_v44 }
  0xb7   : > { %v562_v5 = vand.u32 4294901760, %v561_v12  ;;  %v781_v12 = vsub.f32 %v2692_v49, %v3534_v10  ;;  %v787_v10 = vsub.f32 %v2700_v52, %v3535_v37 }
  0xb8   : > { %v2734_v17 = vsub.f32 %v441_v32, %v2720_v23  ;;  %503 = vmatpush.msra.mxu0 %v2720_v23  ;;  %643 = vmatpush.msra.mxu3 %v2720_v23  ;;  %v776_v32 = vand.u32 4294901760, %v775_v36  ;;  %v799_v36 = vsub.f32 %v2708_v62, %v3538_v8 }
  0xb9   : > { %563 = vmatpush.msra.mxu1 %v562_v5  ;;  %v574_v5 = vand.u32 4294901760, %v573_v33  ;;  %v782_v27 = vand.u32 4294901760, %v781_v12  ;;  %v2776_v33 = vand.u32 4294901760, %v442_v3  ;;  %v788_v44 = vand.u32 4294901760, %v787_v10 }
  0xba   : > { %505 = vmatpush.msra.mxu0 %v2653_v20  ;;  %611 = vmatpush.msra.mxu2 %v2734_v17  ;;  %v566_v18 = vand.u32 4294901760, %v2734_v17 }
  0xbb   : > { %645 = vmatpush.msra.mxu3 %v2653_v20  ;;  %v2758_v1 = vpop.permute.xlu1 %363  ;;  %v2804_v0 = vsub.f32 %v442_v3, %v2776_v33 }
  0xbc   : > { %663 = vmatpush.msrb.mxu0 %v524_v30  ;;  %v367_v37 = vsel %vm365_vm10, %v2662_v34, %v2758_v1  ;;  %v2769_v56 = vpop.permute.xlu0 %378  ;;  %614 = vmatpush.msra.mxu2 %v2689_v48  ;;  %v567_v30 = vsub.f32 %v2734_v17, %v566_v18  ;;  %v2786_v34 = vand.u32 4294901760, %v348_v4 }
  0xbd   : > { %777 = vmatpush.msrb.mxu3 %v776_v32  ;;  %v372_v8 = vsel %vm2601_vm8, %v367_v37, 0.0  ;;  %v382_v32 = vsel %vm380_vm7, %v2611_v60, %v2769_v56  ;;  %617 = vmatmul.f32.vlgmr.msra.gmra.mxu2 %v2742_v54  ;;  %v509_v60 = vsub.f32 %v2742_v54, %v2774_v47  ;;  %vm1259_vm8 = vmand %vm1240_vm15, %vm1250_vm1 }
  0xbe   : > { %667 = vmatpush.msrb.mxu0 %v530_v28  ;;  %739 = vmatpush.msrb.mxu2 %v2631_v11  ;;  %v2788_v17 = vand.u32 4294901760, %v372_v8  ;;  %v387_v12 = vsel %vm2643_vm9, %v382_v32, 0.0  ;;  %v568_v57 = vand.u32 4294901760, %v567_v30  ;;  %v794_v28 = vand.u32 4294901760, %v793_v63 }
  0xbf   : > { %783 = vmatpush.msrb.mxu3 %v782_v27  ;;  %v2793_v37 = vand.u32 4294901760, %v387_v12  ;;  %v3549_v63 = vand.u32 4294901760, %v2595_v55  ;;  %v2821_v42 = vand.u32 4294901760, %v509_v60  ;;  %v816_v55 = vand.u32 4294901760, %v2804_v0 }
  0xc0   : > { %671 = vmatpush.msrb.mxu0 %v536_v31  ;;  %741 = vmatpush.msrb.mxu2 %v2657_v29  ;;  %v2799_v25 = vsub.f32 %v372_v8, %v2788_v17  ;;  %v2813_v31 = vsub.f32 %v348_v4, %v2786_v34  ;;  %v3550_v4 = vand.u32 4294901760, %v2639_v16  ;;  %v3551_v16 = vand.u32 4294901760, %v2695_v50 }
  0xc1   : > { %789 = vmatpush.msrb.mxu3 %v788_v44  ;;  %569 = vmatpush.msra.mxu1 %v568_v57  ;;  %v2807_v10 = vsub.f32 %v387_v12, %v2793_v37  ;;  %v800_v44 = vand.u32 4294901760, %v799_v36  ;;  %v2842_v27 = vadd.s32 256, %v2503_v6  ;;  %v817_v30 = vsub.f32 %v2804_v0, %v816_v55 }
  0xc2   : > { %675 = vmatpush.msrb.mxu0 %v3548_v24  ;;  %743 = vmatpush.msrb.mxu2 %v2677_v43  ;;  %v810_v8 = vand.u32 4294901760, %v2799_v25  ;;  %v3552_v32 = vand.u32 4294901760, %v2689_v48 }
  0xc3   : > { %795 = vmatpush.msrb.mxu3 %v794_v28  ;;  %575 = vmatpush.msra.mxu1 %v574_v5  ;;  %v804_v3 = vand.u32 4294901760, %v2807_v10 }
  0xc4   : > { %679 = vmatpush.msrb.mxu0 %v3549_v63  ;;  %745 = vmatpush.msrb.mxu2 %v2675_v41  ;;  %v811_v36 = vsub.f32 %v2799_v25, %v810_v8 }
  0xc5   : > { %709 = vmatpush.msrb.mxu1 %v2542_v26  ;;  %801 = vmatpush.msrb.mxu3 %v800_v44  ;;  %v805_v5 = vsub.f32 %v2807_v10, %v804_v3  ;;  %v822_v26 = vand.u32 4294901760, %v2813_v31  ;;  %v2991_v44 = vand.u32 4294901760, %v2726_v40 }
  0xc6   : > { %683 = vmatpush.msrb.mxu0 %v3550_v4  ;;  %747 = vmatpush.msrb.mxu2 %v2684_v45 }
  0xc7   : > { %711 = vmatpush.msrb.mxu1 %v2528_v21  ;;  %649 = vmatmul.f32.vlgmr.msra.gmra.mxu3 %v2774_v47  ;;  %v806_v21 = vand.u32 4294901760, %v805_v5  ;;  %v823_v50 = vsub.f32 %v2813_v31, %v822_v26 }
  0xc8   : > { %687 = vmatpush.msrb.mxu0 %v3551_v16  ;;  %749 = vmatpush.msrb.mxu2 %v2793_v37 }
  0xc9   : > { %713 = vmatpush.msrb.mxu1 %v2516_v15  ;;  %511 = vmatmul.f32.vlgmr.msra.gmra.mxu0 %v2821_v42  ;;  %v812_v15 = vand.u32 4294901760, %v811_v36  ;;  %v824_v12 = vand.u32 4294901760, %v823_v50 }
  0xca   : > { %691 = vmatpush.msrb.mxu0 %v566_v18  ;;  %751 = vmatpush.msrb.mxu2 %v2788_v17  ;;  %v818_v18 = vand.u32 4294901760, %v817_v30 }
  0xcb   : > { %715 = vmatpush.msrb.mxu1 %v2572_v39  ;;  %807 = vmatpush.msrb.mxu3 %v806_v21  ;;  %v2310_v39 = vadd.s32 4294967295, %v2842_v27 }
  0xcc   : > { %695 = vmatpush.msrb.mxu0 %v3552_v32  ;;  %753 = vmatpush.msrb.mxu2 %v2776_v33 }
  0xcd   : > { %717 = vmatpush.msrb.mxu1 %v2590_v51  ;;  %813 = vmatpush.msrb.mxu3 %v812_v15  ;;  %v3553_v51 = vand.u32 4294901760, %v2665_v35  ;;  %v328_v48 = vand.u32 15, %v2310_v39 }
  0xce   : > { %577 = vmatmul.f32.vlgmr.msra.gmra.mxu1 %v2714_v14  ;;  %840 = vmatpush.msra.mxu0 %v2665_v35 }
  0xcf   : > { %719 = vmatpush.msrb.mxu1 %v2624_v7  ;;  %755 = vmatpush.msrb.mxu2 %v2786_v34  ;;  %v3554_v7 = vand.u32 4294901760, %v2692_v49  ;;  %vm2873_vm13 = vcmp.lt.s32.totalorder %v328_v48, 15  ;;  %vm2893_vm14 = vcmp.gt.s32.totalorder %v328_v48, 0 }
  0xd0   : > { %819 = vmatpush.msrb.mxu3 %v818_v18  ;;  %761 = vmatmul.f32.vlgmr.msrb.gmra.mxu2 %v2821_v42 }
  0xd1   : > { %843 = vmatpush.msra.mxu0 %v2692_v49  ;;  %913 = vmatpush.msra.mxu2 %v3553_v51  ;;  %v471_v49 = vld [vmem:[%s3524_s2] sm:$0xff] }
  0xd2   : > { %721 = vmatpush.msrb.mxu1 %v2686_v46  ;;  %825 = vmatpush.msrb.mxu3 %v824_v12  ;;  %v3557_v46 = vand.u32 4294901760, %v2700_v52 }
  0xd3   : > { %827 = vmatmul.f32.vlgmr.msrb.gmra.mxu3 %v2714_v14  ;;  %846 = vmatpush.msra.mxu0 %v2700_v52  ;;  %v3558_v52 = vand.u32 4294901760, %v2705_v61 }
  0xd4   : > { %917 = vmatpush.msra.mxu2 %v3554_v7  ;;  %959 = vmatpush.msra.mxu3 %v2631_v11 }
  0xd5   : > { %723 = vmatpush.msrb.mxu1 %v2720_v23  ;;  %697 = vmatmul.f32.vlgmr.msrb.gmra.mxu0 %v2714_v14  ;;  %v433_v23 = vsel %vm2873_vm13, %v2506_v9, 0.0  ;;  %v3561_v9 = vand.u32 4294901760, %v2708_v62 }
  0xd6   : > { %849 = vmatpush.msra.mxu0 %v2705_v61  ;;  %921 = vmatpush.msra.mxu2 %v3557_v46  ;;  %v403_v61 = vsel %vm2873_vm13, %v2592_v53, 0.0 }
  0xd7   : > { %961 = vmatpush.msra.mxu3 %v2657_v29  ;;  %725 = vmatpush.msrb.mxu1 %v2653_v20  ;;  %v2900_v20 = vand.u32 4294901760, %v433_v23  ;;  %v2929_v53 = vand.u32 4294901760, %v403_v61 }
  0xd8   : > { %727 = vmatmul.f32.vlgmr.msrb.gmra.mxu1 %v2714_v14  ;;  %852 = vmatpush.msra.mxu0 %v2708_v62 }
  0xd9   : > { %879 = vmatpush.msra.mxu1 %v2631_v11  ;;  %925 = vmatpush.msra.mxu2 %v3558_v52  ;;  %v418_v11 = vsel %vm2893_vm14, %v2650_v19, 0.0  ;;  %v2922_v19 = vsub.f32 %v433_v23, %v2900_v20  ;;  %v2956_v28 = vsub.f32 %v403_v61, %v2929_v53 }
  0xda   : > { %963 = vmatpush.msra.mxu3 %v2677_v43  ;;  %474 = vperm.xlu0 %2348, %v471_v49  }
  0xdb   : > { %855 = vmatpush.msra.mxu0 %v2807_v10  ;;  %881 = vmatpush.msra.mxu1 %v2657_v29  ;;  %v2914_v29 = vand.u32 4294901760, %v2609_v59 }
  0xdc   : > { %929 = vmatpush.msra.mxu2 %v3561_v9  ;;  %965 = vmatpush.msra.mxu3 %v2675_v41 }
  0xdd   : > { %858 = vmatpush.msra.mxu0 %v2799_v25  ;;  %883 = vmatpush.msra.mxu1 %v2677_v43  ;;  %v2924_v43 = vand.u32 4294901760, %v418_v11  ;;  %v2935_v62 = vsub.f32 %v2609_v59, %v2914_v29  ;;  %v1024_v25 = vand.u32 4294901760, %v2922_v19 }
  0xde   : > { %933 = vmatpush.msra.mxu2 %v804_v3  ;;  %967 = vmatpush.msra.mxu3 %v2684_v45 }
  0xdf   : > { %861 = vmatpush.msra.mxu0 %v2804_v0  ;;  %885 = vmatpush.msra.mxu1 %v2675_v41  ;;  %v388_v41 = vsel %vm2893_vm14, %v2769_v56, 0.0  ;;  %v2950_v59 = vsub.f32 %v418_v11, %v2924_v43  ;;  %v373_v56 = vsel %vm2873_vm13, %v2758_v1, 0.0  ;;  %v1030_v60 = vand.u32 4294901760, %v2935_v62 }
  0xe0   : > { %937 = vmatpush.msra.mxu2 %v810_v8  ;;  %969 = vmatpush.msra.mxu3 %v2793_v37  ;;  %v349_v0 = vsel %vm2893_vm14, %v2463_v2, 0.0  ;;  %v1025_v1 = vsub.f32 %v2922_v19, %v1024_v25  ;;  %v2980_v24 = vand.u32 4294901760, %v373_v56  ;;  %vm1245_vm13 = vcmp.le.s32.totalorder %v2842_v27, 288 }
  0xe1   : > { %864 = vmatpush.msra.mxu0 %v2813_v31  ;;  %887 = vmatpush.msra.mxu1 %v2684_v45  ;;  %v2947_v45 = vand.u32 4294901760, %v2633_v13  ;;  %v1036_v2 = vand.u32 4294901760, %v2950_v59  ;;  %v2988_v31 = vand.u32 4294901760, %v349_v0  ;;  %v1031_v8 = vsub.f32 %v2935_v62, %v1030_v60 }
  0xe2   : > { %941 = vmatpush.msra.mxu2 %v816_v55  ;;  %971 = vmatpush.msra.mxu3 %v2788_v17  ;;  %v1026_v63 = vand.u32 4294901760, %v1025_v1  ;;  %vm1265_vm14 = vcmp.lt.s32.totalorder %v2842_v27, 273  ;;  %v1904_v27 = vld [vmem:[%s3528_s6] sm:$0xff] }
  0xe3   : > { %867 = vmatmul.f32.vlgmr.msra.gmra.mxu0 %v2742_v54  ;;  %889 = vmatpush.msra.mxu1 %v2793_v37  ;;  %v2963_v37 = vand.u32 4294901760, %v388_v41  ;;  %v2978_v10 = vsub.f32 %v2633_v13, %v2947_v45  ;;  %v1037_v3 = vsub.f32 %v2950_v59, %v1036_v2  ;;  %v1032_v55 = vand.u32 4294901760, %v1031_v8  ;;  %vm1274_vm1 = vmand %vm1245_vm13, %vm1265_vm14 }
  0xe4   : > { %989 = vmatpush.msrb.mxu0 %v2900_v20  ;;  %945 = vmatpush.msra.mxu2 %v822_v26  ;;  %v1071_v36 = vsub.f32 %v349_v0, %v2988_v31 }
  0xe5   : > { %973 = vmatpush.msra.mxu3 %v2776_v33  ;;  %891 = vmatpush.msra.mxu1 %v2788_v17  ;;  %v1042_v17 = vand.u32 4294901760, %v2956_v28  ;;  %v2994_v13 = vsub.f32 %v388_v41, %v2963_v37  ;;  %v1048_v4 = vand.u32 4294901760, %v2978_v10  ;;  %v1038_v16 = vand.u32 4294901760, %v1037_v3 }
  0xe6   : > { %1090 = vmatpush.msrb.mxu2 %v2922_v19  ;;  %991 = vmatpush.msrb.mxu0 %v2914_v29  ;;  %v1072_v32 = vand.u32 4294901760, %v1071_v36 }
  0xe7   : > { %975 = vmatpush.msra.mxu3 %v2786_v34  ;;  %947 = vmatmul.f32.vlgmr.msra.gmra.mxu2 %v2714_v14  ;;  %v1043_v5 = vsub.f32 %v2956_v28, %v1042_v17  ;;  %v1054_v26 = vand.u32 4294901760, %v2994_v13  ;;  %v1049_v21 = vsub.f32 %v2978_v10, %v1048_v4 }
  0xe8   : > { %993 = vmatpush.msrb.mxu0 %v2924_v43  ;;  %1093 = vmatpush.msrb.mxu2 %v2935_v62  ;;  %v1073_v48 = vsub.f32 %v1071_v36, %v1072_v32 }
  0xe9   : > { %1129 = vmatpush.msrb.mxu3 %v2900_v20  ;;  %893 = vmatpush.msra.mxu1 %v2776_v33  ;;  %v3004_v33 = vsub.f32 %v373_v56, %v2980_v24  ;;  %v1044_v30 = vand.u32 4294901760, %v1043_v5  ;;  %v1055_v50 = vsub.f32 %v2994_v13, %v1054_v26  ;;  %v1050_v39 = vand.u32 4294901760, %v1049_v21 }
  0xea   : > { %977 = vmatmul.f32.vlgmr.msra.gmra.mxu3 %v2714_v14  ;;  %995 = vmatpush.msrb.mxu0 %v2929_v53  ;;  %v1074_v46 = vand.u32 4294901760, %v1073_v48 }
  0xeb   : > { %1096 = vmatpush.msrb.mxu2 %v2950_v59  ;;  %1131 = vmatpush.msrb.mxu3 %v2914_v29  ;;  %v1056_v12 = vand.u32 4294901760, %v1055_v50 }
  0xec   : > { %895 = vmatpush.msra.mxu1 %v2786_v34  ;;  %997 = vmatpush.msrb.mxu0 %v2947_v45  ;;  %v1065_v34 = vsub.f32 %v2726_v40, %v2991_v44  ;;  %v1060_v40 = vand.u32 4294901760, %v3004_v33 }
  0xed   : > { %899 = vmatmul.f32.vlgmr.msra.gmra.mxu1 %v2774_v47  ;;  %1099 = vmatpush.msrb.mxu2 %v2956_v28 }
  0xee   : > { %1027 = vmatpush.msrb.mxu1 %v1026_v63  ;;  %1133 = vmatpush.msrb.mxu3 %v2924_v43  ;;  %v1066_v15 = vand.u32 4294901760, %v1065_v34  ;;  %v1061_v18 = vsub.f32 %v3004_v33, %v1060_v40 }
  0xef   : > { %999 = vmatpush.msrb.mxu0 %v2963_v37  ;;  %1102 = vmatpush.msrb.mxu2 %v2978_v10 }
  0xf0   : > { %1033 = vmatpush.msrb.mxu1 %v1032_v55  ;;  %1135 = vmatpush.msrb.mxu3 %v2929_v53  ;;  %v1067_v51 = vsub.f32 %v1065_v34, %v1066_v15  ;;  %v1062_v7 = vand.u32 4294901760, %v1061_v18 }
  0xf1   : > { %1001 = vmatpush.msrb.mxu0 %v2980_v24  ;;  %1105 = vmatpush.msrb.mxu2 %v2994_v13 }
  0xf2   : > { %1039 = vmatpush.msrb.mxu1 %v1038_v16  ;;  %1137 = vmatpush.msrb.mxu3 %v2947_v45  ;;  %v1068_v35 = vand.u32 4294901760, %v1067_v51 }
  0xf3   : > { %1003 = vmatpush.msrb.mxu0 %v2991_v44  ;;  %1108 = vmatpush.msrb.mxu2 %v3004_v33 }
  0xf4   : > { %1045 = vmatpush.msrb.mxu1 %v1044_v30  ;;  %1139 = vmatpush.msrb.mxu3 %v2963_v37  ;;  %v335_v30 = vand.u32 15, %v2503_v6 }
  0xf5   : > { %1005 = vmatpush.msrb.mxu0 %v2988_v31  ;;  %1111 = vmatpush.msrb.mxu2 %v1065_v34 }
  0xf6   : > { %1051 = vmatpush.msrb.mxu1 %v1050_v39  ;;  %1141 = vmatpush.msrb.mxu3 %v2980_v24 }
  0xf7   : > { %1011 = vmatmul.f32.vlgmr.msrb.gmra.mxu0 %v2821_v42  ;;  %1114 = vmatpush.msrb.mxu2 %v1071_v36 }
  0xf8   : > { %1163 = vmatpush.msra.mxu0 %v1024_v25  ;;  %1057 = vmatpush.msrb.mxu1 %v1056_v12 }
  0xf9   : > { %1143 = vmatpush.msrb.mxu3 %v2991_v44  ;;  %1117 = vmatmul.f32.vlgmr.msrb.gmra.mxu2 %v2742_v54 }
  0xfa   : > { %1167 = vmatpush.msra.mxu0 %v1030_v60  ;;  %1063 = vmatpush.msrb.mxu1 %v1062_v7 }
  0xfb   : > { %1145 = vmatpush.msrb.mxu3 %v2988_v31 }
  0xfc   : > { %1171 = vmatpush.msra.mxu0 %v1036_v2  ;;  %1069 = vmatpush.msrb.mxu1 %v1068_v35 }
  0xfd   : > { %1149 = vmatmul.f32.vlgmr.msrb.gmra.mxu3 %v2774_v47 }
  0xfe   : > { %1175 = vmatpush.msra.mxu0 %v1042_v17  ;;  %1075 = vmatpush.msrb.mxu1 %v1074_v46 }
  0xff   : > { %1077 = vmatmul.f32.vlgmr.msrb.gmra.mxu1 %v2714_v14 }
 0x100   : > { %1179 = vmatpush.msra.mxu0 %v1048_v4  ;;  %1209 = vmatpush.msra.mxu1 %v2900_v20 }
 0x102   : > { %1183 = vmatpush.msra.mxu0 %v1054_v26  ;;  %1211 = vmatpush.msra.mxu1 %v2914_v29 }
 0x104   : > { %1187 = vmatpush.msra.mxu0 %v1060_v40  ;;  %1213 = vmatpush.msra.mxu1 %v2924_v43 }
 0x106   : > { %1191 = vmatpush.msra.mxu0 %v1066_v15  ;;  %1215 = vmatpush.msra.mxu1 %v2929_v53 }
 0x108   : > { %1195 = vmatpush.msra.mxu0 %v1072_v32  ;;  %1217 = vmatpush.msra.mxu1 %v2947_v45 }
 0x109   : > { %1197 = vmatmul.f32.vlgmr.msra.gmra.mxu0 %v2714_v14 }
 0x10a   : > { %1219 = vmatpush.msra.mxu1 %v2963_v37 }
 0x10c   : > { %1221 = vmatpush.msra.mxu1 %v2980_v24 }
 0x10e   : > { %1223 = vmatpush.msra.mxu1 %v2991_v44 }
 0x110   : > { %1225 = vmatpush.msra.mxu1 %v2988_v31 }
 0x111   : > { %1227 = vmatmul.f32.vlgmr.msra.gmra.mxu1 %v2714_v14 }
 0x140   : > { %v618_v52 = vpop.f32.mrf.mxu2 }
 0x146   : > { %v512_v47 = vpop.f32.mrf.mxu0 }
 0x14a   : > { %v650_v20 = vpop.f32.mrf.mxu3 }
 0x14b   : > { %v578_v54 = vpop.f32.mrf.mxu1 }
 0x14c   : > { %v475_v42 = vpop.permute.xlu0 %474 }
 0x14d   : > { %v513_v49 = vadd.f32 %v512_v47, %v475_v42 }
 0x14f   : > { %v579_v23 = vadd.f32 %v578_v54, %v513_v49 }
 0x151   : > { %v619_v57 = vadd.f32 %v618_v52, %v579_v23 }
 0x152   : > { %v698_v9 = vpop.f32.mrf.mxu0 }
 0x153   : > { %v651_v11 = vadd.f32 %v650_v20, %v619_v57  ;;  %v762_v62 = vpop.f32.mrf.mxu2 }
 0x154   : > { %v763_v41 = vadd.f32 %v762_v62, %v475_v42 }
 0x155   : > { %v699_v61 = vadd.f32 %v698_v9, %v651_v11  ;;  %v728_v29 = vpop.f32.mrf.mxu1 }
 0x156   : > { %v828_v25 = vpop.f32.mrf.mxu3 }
 0x157   : > { %v729_v19 = vadd.f32 %v728_v29, %v699_v61  ;;  %v829_v59 = vadd.f32 %v828_v25, %v763_v41  ;;  %v1387_v29 = vld [vmem:[%s3525_s3] sm:$0xff] }
 0x158   : > { %v1395_v25 = vsel %vm477_vm11, %v1387_v29, 0 }
 0x159   : > { %vm1231_vm4 = vcmp.gt.f32.partialorder %v729_v19, 0.0  ;;  %v1234_v43 = vmul.f32 0.01, %v729_v19 }
 0x15b   : > { %v1237_v14 = vsel %vm1231_vm4, %v729_v19, %v1234_v43  ;;  %vm3116_vm4 = vcmp.lt.s32.totalorder %v335_v30, 15 }
 0x15c   : > { %v3064_v53 = vsel %vm1259_vm8, %v1237_v14, 0.0  ;;  %vm3172_vm8 = vcmp.gt.s32.totalorder %v335_v30, 0 }
 0x15d   : > { %1321 = vrot.lane.b32.xlu2 %v3064_v53, %s2377_s12  ;;  %1333 = vrot.lane.b32.xlu0 %v3064_v53, %s2374_s9 }
 0x15e   : > { %1345 = vrot.lane.b32.xlu1 %v3064_v53, %s2376_s11 }
 0x160   : > { %v868_v45 = vpop.f32.mrf.mxu0 }
 0x161   : > { %v869_v28 = vadd.f32 %v868_v45, %v829_v59 }
 0x165   : > { %1297 = vrot.lane.b32.xlu2 %v3064_v53, %s2380_s15  ;;  %1309 = vrot.lane.b32.xlu0 %v3064_v53, %s2378_s13 }
 0x166   : > { %1377 = vrot.lane.b32.xlu1 %v3064_v53, %s2375_s10 }
 0x16a   : > { %v900_v56 = vpop.f32.mrf.mxu1  ;;  %v948_v37 = vpop.f32.mrf.mxu2 }
 0x16b   : > { %v901_v60 = vadd.f32 %v900_v56, %v869_v28 }
 0x16d   : > { %v949_v0 = vadd.f32 %v948_v37, %v901_v60  ;;  %v978_v1 = vpop.f32.mrf.mxu3 }
 0x16e   : > { %1367 = vrot.lane.b32.xlu1 %v3064_v53, %s2379_s14 }
 0x16f   : > { %v979_v10 = vadd.f32 %v978_v1, %v949_v0  ;;  %v3188_v1 = vand.u32 4294901760, %v1395_v25 }
 0x171   : > { %vm1232_vm9 = vcmp.gt.f32.partialorder %v979_v10, 0.0  ;;  %v1235_v24 = vmul.f32 0.01, %v979_v10 }
 0x173   : > { %v3080_v2 = vsel %vm1232_vm9, %v979_v10, %v1235_v24 }
 0x174   : > { %1347 = vrot.lane.b32.xlu2 %v3080_v2, %s2376_s11  ;;  %1323 = vrot.lane.b32.xlu0 %v3080_v2, %s2377_s12  ;;  %v1012_v17 = vpop.f32.mrf.mxu0 }
 0x175   : > { %v1013_v44 = vadd.f32 %v1012_v17, %v475_v42 }
 0x176   : > { %1335 = vrot.lane.b32.xlu1 %v3080_v2, %s2374_s9 }
 0x17c   : > { %1379 = vrot.lane.b32.xlu2 %v3080_v2, %s2375_s10  ;;  %1299 = vrot.lane.b32.xlu0 %v3080_v2, %s2380_s15  ;;  %v1078_v31 = vpop.f32.mrf.mxu1  ;;  %v1118_v8 = vpop.f32.mrf.mxu2 }
 0x17d   : > { %v1079_v13 = vadd.f32 %v1078_v31, %v1013_v44 }
 0x17e   : > { %1311 = vrot.lane.b32.xlu1 %v3080_v2, %s2378_s13 }
 0x17f   : > { %v1119_v33 = vadd.f32 %v1118_v8, %v1079_v13  ;;  %v1288_v8 = vsel %vm3172_vm8, %v3064_v53, 0.0 }
 0x180   : > { %v1150_v63 = vpop.f32.mrf.mxu3 }
 0x181   : > { %v1151_v4 = vadd.f32 %v1150_v63, %v1119_v33 }
 0x184   : > { %1369 = vrot.lane.b32.xlu2 %v3080_v2, %s2379_s14 }
 0x186   : > { %1357 = vrot.lane.b32.xlu1 %v3064_v53, %s2381_s16  ;;  %v1198_v3 = vpop.f32.mrf.mxu0 }
 0x187   : > { %v1199_v5 = vadd.f32 %v1198_v3, %v1151_v4  ;;  %v3213_v3 = vsub.f32 %v1395_v25, %v3188_v1 }
 0x18c   : > { %1359 = vrot.lane.b32.xlu2 %v3080_v2, %s2381_s16 }
 0x18e   : > { %v1228_v34 = vpop.f32.mrf.mxu1 }
 0x18f   : > { %v1229_v55 = vadd.f32 %v1228_v34, %v1199_v5 }
 0x191   : > { %vm1233_vm15 = vcmp.gt.f32.partialorder %v1229_v55, 0.0  ;;  %v1236_v26 = vmul.f32 0.01, %v1229_v55 }
 0x193   : > { %v1239_v36 = vsel %vm1233_vm15, %v1229_v55, %v1236_v26 }
 0x194   : > { %v1283_v16 = vsel %vm1274_vm1, %v1239_v36, 0.0 }
 0x195   : > { %1349 = vrot.lane.b32.xlu0 %v1283_v16, %s2376_s11  ;;  %1381 = vrot.lane.b32.xlu1 %v1283_v16, %s2375_s10  ;;  %s2313_s10 = sshll.u32 %s3575_s24, 4 }
 0x196   : > { %1337 = vrot.lane.b32.xlu2 %v1283_v16, %s2374_s9 }
 0x19d   : > { %1325 = vrot.lane.b32.xlu0 %v1283_v16, %s2377_s12  ;;  %1371 = vrot.lane.b32.xlu1 %v1283_v16, %s2379_s14 }
 0x19e   : > { %1313 = vrot.lane.b32.xlu2 %v1283_v16, %s2378_s13  ;;  %s314_s13 = scalar_lea.vmem %s3529_s7, %s2313_s10 }
 0x1a5   : > { %1301 = vrot.lane.b32.xlu0 %v1283_v16, %s2380_s15  ;;  %1361 = vrot.lane.b32.xlu1 %v1283_v16, %s2381_s16 }
 0x1ad   : > { %1907 = vperm.xlu0 %2348, %v1904_v27  }
 0x1b7   : > { %v1322_v21 = vpop.permute.xlu2 %1321 }
 0x1bf   : > { %v1298_v40 = vpop.permute.xlu2 %1297 }
 0x1ce   : > { %v3114_v50 = vpop.permute.xlu2 %1347 }
 0x1cf   : > { %v1334_v51 = vpop.permute.xlu0 %1333 }
 0x1d0   : > { %v1346_v32 = vpop.permute.xlu1 %1345 }
 0x1d1   : > { %v1351_v39 = vsel %vm425_vm3, %v1346_v32, %v3114_v50 }
 0x1d2   : > { %v1355_v18 = vsel %vm3116_vm4, %v1351_v39, 0.0  ;;  %v3249_v39 = vand.u32 4294901760, %v3213_v3 }
 0x1d3   : > { %v3124_v12 = vand.u32 4294901760, %v1355_v18 }
 0x1d5   : > { %v3127_v48 = vsub.f32 %v1355_v18, %v3124_v12  ;;  %1405 = vmatpush.msra.mxu2 %v3124_v12  ;;  %1545 = vmatpush.msrb.mxu1 %v3124_v12 }
 0x1d6   : > { %v3133_v7 = vpop.permute.xlu2 %1379 }
 0x1d7   : > { %v1440_v6 = vand.u32 4294901760, %v3127_v48  ;;  %1506 = vmatpush.msrb.mxu0 %v3127_v48  ;;  %v1310_v23 = vpop.permute.xlu0 %1309 }
 0x1d8   : > { %v1378_v35 = vpop.permute.xlu1 %1377 }
 0x1d9   : > { %v1383_v46 = vsel %vm464_vm2, %v1378_v35, %v3133_v7  ;;  %v1441_v47 = vsub.f32 %v3127_v48, %v1440_v6 }
 0x1da   : > { %v3140_v54 = vand.u32 4294901760, %v1383_v46 }
 0x1db   : > { %v1442_v42 = vand.u32 4294901760, %v1441_v47 }
 0x1dc   : > { %v3143_v49 = vsub.f32 %v1383_v46, %v3140_v54  ;;  %1407 = vmatpush.msra.mxu2 %v3140_v54  ;;  %1547 = vmatpush.msrb.mxu1 %v3140_v54 }
 0x1dd   : > { %1443 = vmatpush.msra.mxu3 %v1442_v42 }
 0x1de   : > { %1509 = vmatpush.msrb.mxu0 %v3143_v49  ;;  %v1446_v52 = vand.u32 4294901760, %v3143_v49  ;;  %v3152_v11 = vpop.permute.xlu2 %1369 }
 0x1e0   : > { %v1368_v57 = vpop.permute.xlu1 %1367  ;;  %v1447_v20 = vsub.f32 %v3143_v49, %v1446_v52 }
 0x1e1   : > { %v1373_v61 = vsel %vm452_vm6, %v1368_v57, %v3152_v11  ;;  %v1425_v57 = vsub.f32 %v3213_v3, %v3249_v39 }
 0x1e2   : > { %v1448_v9 = vand.u32 4294901760, %v1447_v20  ;;  %v3161_v43 = vand.u32 4294901760, %v1373_v61 }
 0x1e3   : > { %v3275_v59 = vand.u32 4294901760, %v1425_v57 }
 0x1e4   : > { %1449 = vmatpush.msra.mxu3 %v1448_v9  ;;  %v3181_v37 = vsub.f32 %v1373_v61, %v3161_v43 }
 0x1e6   : > { %v3159_v19 = vpop.permute.xlu0 %1323  ;;  %v1464_v13 = vand.u32 4294901760, %v3181_v37  ;;  %v3215_v4 = vpop.permute.xlu2 %1359 }
 0x1e7   : > { %v1327_v14 = vsel %vm395_vm5, %v1322_v21, %v3159_v19 }
 0x1e8   : > { %v1331_v62 = vsel %vm3116_vm4, %v1327_v14, 0.0  ;;  %v3167_v41 = vpop.permute.xlu1 %1335  ;;  %v1465_v21 = vsub.f32 %v3181_v37, %v1464_v13 }
 0x1e9   : > { %v3170_v45 = vand.u32 4294901760, %v1331_v62  ;;  %v1339_v28 = vsel %vm410_vm0, %v1334_v51, %v3167_v41 }
 0x1ea   : > { %v1343_v56 = vsel %vm3172_vm8, %v1339_v28, 0.0  ;;  %v1466_v18 = vand.u32 4294901760, %v1465_v21 }
 0x1eb   : > { %v3184_v60 = vsub.f32 %v1331_v62, %v3170_v45  ;;  %v3186_v0 = vand.u32 4294901760, %v1343_v56  ;;  %v336_v62 = vand.u32 15, %v2570_v38 }
 0x1ed   : > { %v3191_v10 = vsub.f32 %v1343_v56, %v3186_v0  ;;  %1409 = vmatpush.msra.mxu2 %v3186_v0  ;;  %1549 = vmatpush.msrb.mxu1 %v3186_v0  ;;  %v1458_v24 = vand.u32 4294901760, %v3184_v60  ;;  %vm3287_vm11 = vcmp.gt.s32.totalorder %v336_v62, 0 }
 0x1ee   : > { %v3196_v17 = vpop.permute.xlu0 %1299 }
 0x1ef   : > { %v1303_v31 = vsel %vm365_vm10, %v1298_v40, %v3196_v17  ;;  %1411 = vmatpush.msra.mxu2 %v3170_v45  ;;  %1512 = vmatpush.msrb.mxu0 %v3191_v10  ;;  %v1452_v44 = vand.u32 4294901760, %v3191_v10  ;;  %v1459_v55 = vsub.f32 %v3184_v60, %v1458_v24  ;;  %v3241_v40 = vand.u32 4294901760, %v1288_v8 }
 0x1f0   : > { %v1307_v33 = vsel %vm3116_vm4, %v1303_v31, 0.0  ;;  %1551 = vmatpush.msrb.mxu1 %v3170_v45  ;;  %v3210_v63 = vpop.permute.xlu1 %1311  ;;  %v1338_v9 = vpop.permute.xlu2 %1337 }
 0x1f1   : > { %v3217_v5 = vand.u32 4294901760, %v1307_v33  ;;  %v1315_v34 = vsel %vm380_vm7, %v1310_v23, %v3210_v63  ;;  %1413 = vmatpush.msra.mxu2 %v3161_v43  ;;  %1515 = vmatpush.msrb.mxu0 %v3184_v60  ;;  %v1453_v53 = vsub.f32 %v3191_v10, %v1452_v44  ;;  %v1460_v15 = vand.u32 4294901760, %v1459_v55 }
 0x1f2   : > { %v1319_v26 = vsel %vm3172_vm8, %v1315_v34, 0.0  ;;  %1553 = vmatpush.msrb.mxu1 %v3161_v43  ;;  %v3257_v46 = vsub.f32 %v1288_v8, %v3241_v40  ;;  %v1340_v56 = vsel %vm410_vm0, %v3167_v41, %v1338_v9  ;;  %vm3302_vm0 = vcmp.lt.s32.totalorder %v336_v62, 15 }
 0x1f3   : > { %v3233_v36 = vsub.f32 %v1307_v33, %v3217_v5  ;;  %v3235_v16 = vand.u32 4294901760, %v1319_v26  ;;  %1518 = vmatpush.msrb.mxu0 %v3181_v37  ;;  %v1454_v27 = vand.u32 4294901760, %v1453_v53  ;;  %v1344_v41 = vsel %vm3287_vm11, %v1340_v56, 0.0 }
 0x1f4   : > { %v1488_v14 = vand.u32 4294901760, %v3257_v46  ;;  %v3300_v33 = vand.u32 4294901760, %v1344_v41 }
 0x1f5   : > { %v3244_v30 = vsub.f32 %v1319_v26, %v3235_v16  ;;  %1415 = vmatpush.msra.mxu2 %v3235_v16  ;;  %1455 = vmatpush.msra.mxu3 %v1454_v27  ;;  %v1476_v32 = vand.u32 4294901760, %v3233_v36 }
 0x1f6   : > { %1555 = vmatpush.msrb.mxu1 %v3235_v16  ;;  %v1489_v31 = vsub.f32 %v3257_v46, %v1488_v14  ;;  %v3319_v60 = vsub.f32 %v1344_v41, %v3300_v33 }
 0x1f7   : > { %1417 = vmatpush.msra.mxu2 %v3217_v5  ;;  %1461 = vmatpush.msra.mxu3 %v1460_v15  ;;  %v1470_v51 = vand.u32 4294901760, %v3244_v30  ;;  %v1477_v23 = vsub.f32 %v3233_v36, %v1476_v32 }
 0x1f8   : > { %1521 = vmatpush.msrb.mxu0 %v3244_v30  ;;  %1557 = vmatpush.msrb.mxu1 %v3217_v5  ;;  %v1358_v35 = vpop.permute.xlu1 %1357  ;;  %v1314_v34 = vpop.permute.xlu2 %1313 }
 0x1f9   : > { %v1363_v47 = vsel %vm440_vm12, %v1358_v35, %v3215_v4  ;;  %1467 = vmatpush.msra.mxu3 %v1466_v18  ;;  %v1471_v42 = vsub.f32 %v3244_v30, %v1470_v51  ;;  %v1478_v25 = vand.u32 4294901760, %v1477_v23  ;;  %v1316_v10 = vsel %vm380_vm7, %v3210_v63, %v1314_v34  ;;  %v1903_v35 = vld [vmem:[%s3527_s5] sm:$0xff] }
 0x1fa   : > { %v3267_v20 = vand.u32 4294901760, %v1363_v47  ;;  %1524 = vmatpush.msrb.mxu0 %v3233_v36 }
 0x1fb   : > { %v1472_v61 = vand.u32 4294901760, %v1471_v42 }
 0x1fc   : > { %v1481_v29 = vsub.f32 %v1363_v47, %v3267_v20  ;;  %1419 = vmatpush.msra.mxu2 %v3267_v20  ;;  %1559 = vmatpush.msrb.mxu1 %v3267_v20 }
 0x1fd   : > { %1473 = vmatpush.msra.mxu3 %v1472_v61 }
 0x1fe   : > { %1421 = vmatpush.msra.mxu2 %v3241_v40  ;;  %1527 = vmatpush.msrb.mxu0 %v1481_v29  ;;  %v1482_v28 = vand.u32 4294901760, %v1481_v29 }
 0x1ff   : > { %1561 = vmatpush.msrb.mxu1 %v3241_v40  ;;  %1479 = vmatpush.msra.mxu3 %v1478_v25 }
 0x200   : > { %1579 = vmatpush.msrb.mxu2 %v1440_v6  ;;  %1530 = vmatpush.msrb.mxu0 %v3257_v46  ;;  %v1483_v38 = vsub.f32 %v1481_v29, %v1482_v28  ;;  %v1490_v6 = vand.u32 4294901760, %v1489_v31 }
 0x201   : > { %1427 = vmatmul.f32.vlgmr.msra.gmra.mxu2 %v3275_v59  ;;  %1533 = vmatmul.f32.vlgmr.msrb.gmra.mxu0 %v3213_v3 }
 0x202   : > { %1583 = vmatpush.msrb.mxu2 %v1446_v52  ;;  %v1484_v48 = vand.u32 4294901760, %v1483_v38  ;;  %1565 = vmatmul.f32.vlgmr.msrb.gmra.mxu1 %v3249_v39 }
 0x204   : > { %1587 = vmatpush.msrb.mxu2 %v1452_v44  ;;  %1485 = vmatpush.msra.mxu3 %v1484_v48  ;;  %v3435_v48 = vand.u32 4294901760, %v2531_v22 }
 0x206   : > { %1591 = vmatpush.msrb.mxu2 %v1458_v24  ;;  %1491 = vmatpush.msra.mxu3 %v1490_v6 }
 0x207   : > { %v1350_v49 = vpop.permute.xlu0 %1349  ;;  %v1382_v52 = vpop.permute.xlu1 %1381  ;;  %1493 = vmatmul.f32.vlgmr.msra.gmra.mxu3 %v3188_v1 }
 0x208   : > { %1625 = vmatpush.msrb.mxu3 %v3124_v12  ;;  %v1352_v44 = vsel %vm425_vm3, %v3114_v50, %v1350_v49  ;;  %v1384_v55 = vsel %vm464_vm2, %v3133_v7, %v1382_v52  ;;  %1595 = vmatpush.msrb.mxu2 %v1464_v13  ;;  %v1320_v50 = vsel %vm3287_vm11, %v1316_v10, 0.0  ;;  %v1702_v13 = vand.u32 4294901760, %v3319_v60 }
 0x209   : > { %v1356_v12 = vsel %vm3302_vm0, %v1352_v44, 0.0  ;;  %v3323_v24 = vand.u32 4294901760, %v1384_v55  ;;  %v3343_v26 = vand.u32 4294901760, %v1320_v50  ;;  %vm1910_vm2 = vcmask 64512  }
 0x20a   : > { %1627 = vmatpush.msrb.mxu3 %v3140_v54  ;;  %v3326_v63 = vand.u32 4294901760, %v1356_v12  ;;  %1599 = vmatpush.msrb.mxu2 %v1470_v51  ;;  %v1912_v23 = vsel %vm1910_vm2, %v1903_v35, 0 }
 0x20b   : > { %v3331_v7 = vsub.f32 %v1384_v55, %v3323_v24  ;;  %v3412_v56 = vand.u32 4294901760, %v1912_v23  ;;  %v1956_v55 = vsub.f32 %v2531_v22, %v3435_v48 }
 0x20c   : > { %1629 = vmatpush.msrb.mxu3 %v3186_v0  ;;  %v3335_v37 = vsub.f32 %v1356_v12, %v3326_v63  ;;  %1655 = vmatpush.msra.mxu0 %v3326_v63 }
 0x20d   : > { %1603 = vmatpush.msrb.mxu2 %v1476_v32  ;;  %v1696_v54 = vand.u32 4294901760, %v3331_v7  ;;  %v3440_v53 = vsub.f32 %v1912_v23, %v3412_v56  ;;  %v1957_v22 = vand.u32 4294901760, %v1956_v55 }
 0x20e   : > { %1631 = vmatpush.msrb.mxu3 %v3170_v45  ;;  %v1690_v27 = vand.u32 4294901760, %v3335_v37  ;;  %1657 = vmatpush.msra.mxu0 %v3323_v24 }
 0x20f   : > { %1607 = vmatpush.msrb.mxu2 %v1482_v28  ;;  %v1326_v0 = vpop.permute.xlu0 %1325  ;;  %v1372_v21 = vpop.permute.xlu1 %1371  ;;  %v1697_v36 = vsub.f32 %v3331_v7, %v1696_v54 }
 0x210   : > { %1633 = vmatpush.msrb.mxu3 %v3161_v43  ;;  %v1328_v45 = vsel %vm395_vm5, %v3159_v19, %v1326_v0  ;;  %v1374_v30 = vsel %vm452_vm6, %v3152_v11, %v1372_v21  ;;  %1659 = vmatpush.msra.mxu0 %v3300_v33  ;;  %v1691_v15 = vsub.f32 %v3335_v37, %v1690_v27  ;;  %v3452_v0 = vand.u32 4294901760, %v3440_v53 }
 0x211   : > { %1611 = vmatpush.msrb.mxu2 %v1488_v14  ;;  %v1332_v43 = vsel %vm3302_vm0, %v1328_v45, 0.0  ;;  %v3363_v32 = vand.u32 4294901760, %v1374_v30  ;;  %v1703_v11 = vsub.f32 %v3319_v60, %v1702_v13  ;;  %v3371_v19 = vsub.f32 %v1320_v50, %v3343_v26 }
 0x212   : > { %1635 = vmatpush.msrb.mxu3 %v3235_v16  ;;  %v3373_v18 = vand.u32 4294901760, %v1332_v43  ;;  %v1692_v51 = vand.u32 4294901760, %v1691_v15  ;;  %1613 = vmatmul.f32.vlgmr.msrb.gmra.mxu2 %v3188_v1  ;;  %v1289_v16 = vsel %vm3287_vm11, %v3080_v2, 0.0  ;;  %v1698_v42 = vand.u32 4294901760, %v1697_v36 }
 0x213   : > { %1756 = vmatpush.msra.mxu2 %v3335_v37  ;;  %v3383_v46 = vsub.f32 %v1374_v30, %v3363_v32  ;;  %v1704_v57 = vand.u32 4294901760, %v1703_v11  ;;  %v3396_v9 = vand.u32 4294901760, %v1289_v16  ;;  %v1720_v61 = vand.u32 4294901760, %v3371_v19 }
 0x214   : > { %1637 = vmatpush.msrb.mxu3 %v3217_v5  ;;  %v3388_v47 = vsub.f32 %v1332_v43, %v3373_v18  ;;  %1661 = vmatpush.msra.mxu0 %v3373_v18 }
 0x215   : > { %1759 = vmatpush.msra.mxu2 %v3331_v7  ;;  %1693 = vmatpush.msra.mxu1 %v1692_v51  ;;  %v1714_v2 = vand.u32 4294901760, %v3383_v46  ;;  %v1721_v31 = vsub.f32 %v3371_v19, %v1720_v61  ;;  %v3427_v8 = vsub.f32 %v1289_v16, %v3396_v9  ;;  %v1958_v7 = vsub.f32 %v1956_v55, %v1957_v22 }
 0x216   : > { %1639 = vmatpush.msrb.mxu3 %v3267_v20  ;;  %1663 = vmatpush.msra.mxu0 %v3363_v32  ;;  %v1708_v5 = vand.u32 4294901760, %v3388_v47 }
 0x217   : > { %1762 = vmatpush.msra.mxu2 %v3319_v60  ;;  %1699 = vmatpush.msra.mxu1 %v1698_v42  ;;  %v1302_v29 = vpop.permute.xlu0 %1301  ;;  %v1362_v14 = vpop.permute.xlu1 %1361  ;;  %v1715_v20 = vsub.f32 %v3383_v46, %v1714_v2  ;;  %v1722_v52 = vand.u32 4294901760, %v1721_v31  ;;  %v1738_v44 = vand.u32 4294901760, %v3427_v8  ;;  %v2075_v60 = vand.u32 4294901760, %v2607_v58 }
 0x218   : > { %1641 = vmatpush.msrb.mxu3 %v3241_v40  ;;  %v1304_v62 = vsel %vm365_vm10, %v3196_v17, %v1302_v29  ;;  %v1364_v25 = vsel %vm440_vm12, %v3215_v4, %v1362_v14  ;;  %1665 = vmatpush.msra.mxu0 %v3343_v26  ;;  %v1709_v28 = vsub.f32 %v3388_v47, %v1708_v5 }
 0x219   : > { %1765 = vmatpush.msra.mxu2 %v3388_v47  ;;  %1705 = vmatpush.msra.mxu1 %v1704_v57  ;;  %v1308_v40 = vsel %vm3302_vm0, %v1304_v62, 0.0  ;;  %v3416_v38 = vand.u32 4294901760, %v1364_v25  ;;  %v1716_v34 = vand.u32 4294901760, %v1715_v20  ;;  %v1739_v36 = vsub.f32 %v3427_v8, %v1738_v44 }
 0x21a   : > { %1795 = vmatpush.msra.mxu3 %v3326_v63  ;;  %v3420_v17 = vand.u32 4294901760, %v1308_v40  ;;  %v1710_v4 = vand.u32 4294901760, %v1709_v28 }
 0x21b   : > { %1768 = vmatpush.msra.mxu2 %v3383_v46  ;;  %1643 = vmatmul.f32.vlgmr.msrb.gmra.mxu3 %v3188_v1  ;;  %v3430_v41 = vsub.f32 %v1364_v25, %v3416_v38 }
 0x21c   : > { %1797 = vmatpush.msra.mxu3 %v3323_v24  ;;  %v1725_v6 = vsub.f32 %v1308_v40, %v3420_v17  ;;  %1667 = vmatpush.msra.mxu0 %v3420_v17 }
 0x21d   : > { %1771 = vmatpush.msra.mxu2 %v3371_v19  ;;  %1711 = vmatpush.msra.mxu1 %v1710_v4  ;;  %v1732_v49 = vand.u32 4294901760, %v3430_v41 }
 0x21e   : > { %1799 = vmatpush.msra.mxu3 %v3300_v33  ;;  %1669 = vmatpush.msra.mxu0 %v3416_v38  ;;  %v1726_v10 = vand.u32 4294901760, %v1725_v6 }
 0x21f   : > { %1717 = vmatpush.msra.mxu1 %v1716_v34  ;;  %1774 = vmatpush.msra.mxu2 %v1725_v6  ;;  %v1733_v50 = vsub.f32 %v3430_v41, %v1732_v49 }
 0x220   : > { %1801 = vmatpush.msra.mxu3 %v3373_v18  ;;  %1671 = vmatpush.msra.mxu0 %v3396_v9  ;;  %v1727_v12 = vsub.f32 %v1725_v6, %v1726_v10 }
 0x221   : > { %1723 = vmatpush.msra.mxu1 %v1722_v52  ;;  %1777 = vmatpush.msra.mxu2 %v3430_v41  ;;  %v1734_v37 = vand.u32 4294901760, %v1733_v50 }
 0x222   : > { %1829 = vmatpush.msrb.mxu0 %v1690_v27  ;;  %v1728_v21 = vand.u32 4294901760, %v1727_v12  ;;  %1803 = vmatpush.msra.mxu3 %v3363_v32  ;;  %v1934_v27 = vsub.f32 %v3440_v53, %v3452_v0 }
 0x223   : > { %1677 = vmatmul.f32.vlgmr.msra.gmra.mxu0 %v3275_v59  ;;  %1780 = vmatpush.msra.mxu2 %v3427_v8  ;;  %v1740_v59 = vand.u32 4294901760, %v1739_v36 }
 0x224   : > { %1833 = vmatpush.msrb.mxu0 %v1696_v54  ;;  %1729 = vmatpush.msra.mxu1 %v1728_v21  ;;  %v1959_v54 = vand.u32 4294901760, %v1958_v7 }
 0x225   : > { %1783 = vmatmul.f32.vlgmr.msra.gmra.mxu2 %v3213_v3  ;;  %1805 = vmatpush.msra.mxu3 %v3343_v26  ;;  %v1935_v3 = vand.u32 4294901760, %v1934_v27 }
 0x226   : > { %1837 = vmatpush.msrb.mxu0 %v1702_v13  ;;  %1930 = vmatpush.msrb.mxu2 %v3435_v48  ;;  %v1388_v13 = vld [vmem:[%s3526_s4] sm:$0xff] }
 0x227   : > { %1735 = vmatpush.msra.mxu1 %v1734_v37  ;;  %1807 = vmatpush.msra.mxu3 %v3420_v17 }
 0x228   : > { %1983 = vmatpush.msra.mxu2 %v1956_v55  ;;  %1841 = vmatpush.msrb.mxu0 %v1708_v5 }
 0x229   : > { %1741 = vmatpush.msra.mxu1 %v1740_v59  ;;  %1809 = vmatpush.msra.mxu3 %v3416_v38 }
 0x22a   : > { %1845 = vmatpush.msrb.mxu0 %v1714_v2  ;;  %1743 = vmatmul.f32.vlgmr.msra.gmra.mxu1 %v3188_v1  ;;  %v1908_v2 = vpop.permute.xlu0 %1907 }
 0x22b   : > { %1875 = vmatpush.msrb.mxu1 %v3326_v63  ;;  %1811 = vmatpush.msra.mxu3 %v3396_v9  ;;  %v2102_v63 = vsub.f32 %v2607_v58, %v2075_v60 }
 0x22c   : > { %1849 = vmatpush.msrb.mxu0 %v1720_v61  ;;  %1815 = vmatmul.f32.vlgmr.msra.gmra.mxu3 %v3249_v39 }
 0x22d   : > { %1877 = vmatpush.msrb.mxu1 %v3323_v24  ;;  %1936 = vmatmul.f32.vlgmr.msrb.gmra.mxu2 %v1935_v3  ;;  %v2103_v39 = vand.u32 4294901760, %v2102_v63 }
 0x22e   : > { %1853 = vmatpush.msrb.mxu0 %v1726_v10  ;;  %1960 = vmatpush.msrb.mxu3 %v1959_v54 }
 0x22f   : > { %1879 = vmatpush.msrb.mxu1 %v3300_v33  ;;  %2032 = vmatpush.msrb.mxu2 %v1957_v22  ;;  %v2104_v58 = vsub.f32 %v2102_v63, %v2103_v39 }
 0x230   : > { %2006 = vmatpush.msra.mxu3 %v3435_v48  ;;  %1857 = vmatpush.msrb.mxu0 %v1732_v49 }
 0x231   : > { %1881 = vmatpush.msrb.mxu1 %v3373_v18  ;;  %1391 = vperm.xlu2 %2349, %v1388_v13   ;;  %v2105_v33 = vand.u32 4294901760, %v2104_v58 }
 0x232   : > { %1861 = vmatpush.msrb.mxu0 %v1738_v44 }
 0x233   : > { %1883 = vmatpush.msrb.mxu1 %v3363_v32  ;;  %1863 = vmatmul.f32.vlgmr.msrb.gmra.mxu0 %v3188_v1 }
 0x234   : > { %2076 = vmatpush.msra.mxu0 %v2075_v60  ;;  %1962 = vmatmul.f32.vlgmr.msrb.gmra.mxu3 %v3412_v56 }
 0x235   : > { %1885 = vmatpush.msrb.mxu1 %v3343_v26  ;;  %1986 = vmatmul.f32.vlgmr.msra.gmra.mxu2 %v3440_v53 }
 0x236   : > { %2178 = vmatpush.msrb.mxu0 %v2103_v39  ;;  %2054 = vmatpush.msrb.mxu3 %v3435_v48 }
 0x237   : > { %1887 = vmatpush.msrb.mxu1 %v3420_v17  ;;  %2129 = vmatpush.msra.mxu2 %v2102_v63 }
 0x239   : > { %1889 = vmatpush.msrb.mxu1 %v3416_v38 }
 0x23b   : > { %1891 = vmatpush.msrb.mxu1 %v3396_v9  ;;  %2082 = vmatmul.f32.vlgmr.msra.gmra.mxu0 %v1935_v3 }
 0x23c   : > { %1893 = vmatmul.f32.vlgmr.msrb.gmra.mxu1 %v3188_v1  ;;  %2010 = vmatmul.f32.vlgmr.msra.gmra.mxu3 %v3452_v0 }
 0x23d   : > { %2106 = vmatpush.msra.mxu1 %v2105_v33  ;;  %2034 = vmatmul.f32.vlgmr.msrb.gmra.mxu2 %v3412_v56 }
 0x23e   : > { %2152 = vmatpush.msra.mxu3 %v2075_v60 }
 0x23f   : > { %2200 = vmatpush.msrb.mxu1 %v2075_v60 }
 0x243   : > { %2180 = vmatmul.f32.vlgmr.msrb.gmra.mxu0 %v3412_v56 }
 0x244   : > { %2108 = vmatmul.f32.vlgmr.msra.gmra.mxu1 %v3412_v56  ;;  %2056 = vmatmul.f32.vlgmr.msrb.gmra.mxu3 %v3412_v56 }
 0x245   : > { %2132 = vmatmul.f32.vlgmr.msra.gmra.mxu2 %v3440_v53 }
 0x24c   : > { %2202 = vmatmul.f32.vlgmr.msrb.gmra.mxu1 %v3412_v56  ;;  %2156 = vmatmul.f32.vlgmr.msra.gmra.mxu3 %v3452_v0 }
 0x27e   : > { %v1534_v15 = vpop.f32.mrf.mxu0 }
 0x27f   : > { %v1566_v19 = vpop.f32.mrf.mxu1 }
 0x284   : > { %v1428_v1 = vpop.f32.mrf.mxu2 }
 0x28a   : > { %v1494_v26 = vpop.f32.mrf.mxu3 }
 0x28b   : > { %v1392_v43 = vpop.permute.xlu2 %1391 }
 0x28c   : > { %v1429_v32 = vadd.f32 %v1428_v1, %v1392_v43 }
 0x28e   : > { %v1495_v51 = vadd.f32 %v1494_v26, %v1429_v32 }
 0x290   : > { %v1535_v16 = vadd.f32 %v1534_v15, %v1495_v51 }
 0x292   : > { %v1567_v23 = vadd.f32 %v1566_v19, %v1535_v16 }
 0x295   : > { %v1614_v24 = vpop.f32.mrf.mxu2 }
 0x296   : > { %v1615_v61 = vadd.f32 %v1614_v24, %v1567_v23 }
 0x29e   : > { %v1644_v30 = vpop.f32.mrf.mxu3 }
 0x29f   : > { %v1645_v28 = vadd.f32 %v1644_v30, %v1615_v61 }
 0x2a0   : > { %v1678_v35 = vpop.f32.mrf.mxu0 }
 0x2a1   : > { %v1679_v5 = vadd.f32 %v1678_v35, %v1392_v43  ;;  %v1899_v17 = vmul.f32 0.01, %v1645_v28  ;;  %vm1897_vm3 = vcmp.gt.f32.partialorder %v1645_v28, 0.0 }
 0x2a3   : > { %v1901_v34 = vsel %vm1897_vm3, %v1645_v28, %v1899_v17 }
 0x2a7   : > { %v1744_v46 = vpop.f32.mrf.mxu1 }
 0x2a8   : > { %v1784_v45 = vpop.f32.mrf.mxu2  ;;  %v1745_v14 = vadd.f32 %v1744_v46, %v1679_v5 }
 0x2aa   : > { %v1785_v38 = vadd.f32 %v1784_v45, %v1745_v14 }
 0x2af   : > { %v1816_v18 = vpop.f32.mrf.mxu3 }
 0x2b0   : > { %v1937_v11 = vpop.f32.mrf.mxu2  ;;  %v1864_v29 = vpop.f32.mrf.mxu0  ;;  %v1817_v31 = vadd.f32 %v1816_v18, %v1785_v38 }
 0x2b1   : > { %v1938_v57 = vadd.f32 %v1937_v11, %v1908_v2 }
 0x2b2   : > { %v1865_v52 = vadd.f32 %v1864_v29, %v1817_v31 }
 0x2b7   : > { %v1963_v47 = vpop.f32.mrf.mxu3 }
 0x2b8   : > { %v1987_v42 = vpop.f32.mrf.mxu2  ;;  %v1964_v9 = vadd.f32 %v1963_v47, %v1938_v57  ;;  %v2083_v8 = vpop.f32.mrf.mxu0 }
 0x2b9   : > { %v1894_v20 = vpop.f32.mrf.mxu1  ;;  %v2084_v53 = vadd.f32 %v2083_v8, %v1908_v2 }
 0x2ba   : > { %v1988_v25 = vadd.f32 %v1987_v42, %v1964_v9  ;;  %v1895_v55 = vadd.f32 %v1894_v20, %v1865_v52 }
 0x2bc   : > { %v1900_v36 = vmul.f32 0.01, %v1895_v55  ;;  %vm1898_vm5 = vcmp.gt.f32.partialorder %v1895_v55, 0.0 }
 0x2be   : > { %v1902_v59 = vsel %vm1898_vm5, %v1895_v55, %v1900_v36 }
 0x2bf   : > { %v2011_v62 = vpop.f32.mrf.mxu3 }
 0x2c0   : > { %v2035_v56 = vpop.f32.mrf.mxu2  ;;  %v2012_v40 = vadd.f32 %v2011_v62, %v1988_v25  ;;  %v2181_v0 = vpop.f32.mrf.mxu0 }
 0x2c1   : > { %v2109_v6 = vpop.f32.mrf.mxu1 }
 0x2c2   : > { %v2036_v4 = vadd.f32 %v2035_v56, %v2012_v40  ;;  %v2110_v44 = vadd.f32 %v2109_v6, %v2084_v53 }
 0x2c7   : > { %v2057_v41 = vpop.f32.mrf.mxu3 }
 0x2c8   : > { %v2058_v48 = vadd.f32 %v2057_v41, %v2036_v4  ;;  %v2133_v10 = vpop.f32.mrf.mxu2 }
 0x2c9   : > { %v2134_v12 = vadd.f32 %v2133_v10, %v2110_v44  ;;  %v2203_v22 = vpop.f32.mrf.mxu1 }
 0x2ca   : > { %v2206_v49 = vadd.f32 %v2058_v48, %v1901_v34 }
 0x2cc   : > { %2208 = vst [vmem:[%s314_s13] sm:$0xff] %v2206_v49 }
 0x2cf   : > { %v2157_v50 = vpop.f32.mrf.mxu3 }
 0x2d0   : > { %v2158_v21 = vadd.f32 %v2157_v50, %v2134_v12 }
 0x2d2   : > { %v2182_v37 = vadd.f32 %v2181_v0, %v2158_v21 }
 0x2d4   : > { %v2204_v27 = vadd.f32 %v2203_v22, %v2182_v37 }
 0x2d6   : > { %v2207_v3 = vadd.f32 %v2204_v27, %v1902_v59 }
 0x2d8   : > { %2209 = vst [vmem:[%s314_s13 + $0x8] sm:$0xff] %v2207_v3 }
 0x2d9 PF: > { %s17_s26 = sadd.s32 1, %s2372_s26   ;;  %s3570_s24 = smov %s2368_s25 }
 0x2da   : > { %p14_p5 = scmp.ge.s32.totalorder %s17_s26, 4   ;;  %s3571_s25 = smov %s3573_s27 }
 0x2dc   :  { %16 = sbr.rel (!%p14_p5) target bundleno = 2 (0x2), region = 78 }

</bundles_post_ra>
